<compile_context>
chip_gen: v7x
topology: tpu7x:2x2x1
jax: 0.10.0
libtpu: 0.0.40
codegen_flags: <defaults>
</compile_context>

<pallas_src>
import functools
import math

import jax
import jax.numpy as jnp
from jax.experimental import pallas as pl
from jax.experimental.pallas import tpu as pltpu


def _sdpa(q3, k3, v3, kv_tile):
    """Per-head scaled-dot-product attention on (bb, S, Dh) bf16 tensors -> f32 ctx.
    Scale is pre-folded into q's projection weights.  For S > kv_tile uses
    flash-style online softmax over KV chunks to bound VMEM/vreg pressure."""
    bb, S, Dh = q3.shape
    if kv_tile >= S:
        s = jnp.einsum('bqd,bkd->bqk', q3, k3, preferred_element_type=jnp.float32)
        s = s - jnp.max(s, axis=-1, keepdims=True)
        p = jnp.exp(s)
        p = p * pl.reciprocal(jnp.sum(p, axis=-1, keepdims=True), approx=True)
        return jnp.einsum('bqk,bkd->bqd', p.astype(jnp.bfloat16), v3,
                          preferred_element_type=jnp.float32)

    # Flash-style online softmax over static KV chunks (bounds (bb,S,S) scores).
    m = jnp.full((bb, S, 1), -jnp.inf, jnp.float32)
    l = jnp.zeros((bb, S, 1), jnp.float32)
    acc = jnp.zeros((bb, S, Dh), jnp.float32)
    for c0 in range(0, S, kv_tile):
        c1 = min(c0 + kv_tile, S)
        kc = k3[:, c0:c1, :]
        vc = v3[:, c0:c1, :]
        s = jnp.einsum('bqd,bkd->bqk', q3, kc, preferred_element_type=jnp.float32)
        m_new = jnp.maximum(m, jnp.max(s, axis=-1, keepdims=True))
        alpha = jnp.exp(m - m_new)
        p = jnp.exp(s - m_new)
        l = alpha * l + jnp.sum(p, axis=-1, keepdims=True)
        acc = alpha * acc + jnp.einsum('bqk,bkd->bqd', p.astype(jnp.bfloat16), vc,
                                       preferred_element_type=jnp.float32)
        m = m_new
    return acc * pl.reciprocal(l, approx=True)


def mha_kernel(x_ref, wqkv_ref, wout_ref, gamma_ref, beta_ref, o_ref,
               ln_scr, acc_scr, qkv_scr, ctx_scr, *,
               head_dim, group_size, eps, kv_tile):
    g = pl.program_id(1)                  # head-group index (innermost, "arbitrary")
    bb, S, H = x_ref.shape
    R = bb * S
    G = group_size
    GD = G * head_dim

    # ---- once per batch block: LayerNorm (f32) + residual init of accumulator ----
    @pl.when(g == 0)
    def _init():
        x = x_ref[...].astype(jnp.float32).reshape(R, H)
        mean = jnp.mean(x, axis=-1, keepdims=True)
        xc = x - mean
        var = jnp.mean(xc * xc, axis=-1, keepdims=True)
        ln = xc * jax.lax.rsqrt(var + eps)
        ln = ln * gamma_ref[...].astype(jnp.float32) + beta_ref[...].astype(jnp.float32)
        ln_scr[...] = ln.astype(ln_scr.dtype)   # bf16 MXU operand, reused by all groups
        acc_scr[...] = x                        # residual, f32 accumulator

    # ---- per head-group: one wide QKV matmul over bb*S rows (N = 3*G*Dh lanes) ----
    ln = ln_scr[...]                                             # (R, H) bf16
    qkv = jnp.dot(ln, wqkv_ref[0], preferred_element_type=jnp.float32)  # (R, 3*GD) f32
    qkv_scr[...] = qkv.astype(qkv_scr.dtype)                     # bf16 staging for slices

    # ---- per head inside the group: attention (small Dh-wide slices stay in VMEM) ----
    for hg in range(G):
        lo = hg * head_dim
        hi = lo + head_dim
        q3 = qkv_scr[:, lo:hi].reshape(bb, S, head_dim)
        k3 = qkv_scr[:, GD + lo:GD + hi].reshape(bb, S, head_dim)
        v3 = qkv_scr[:, 2 * GD + lo:2 * GD + hi].reshape(bb, S, head_dim)
        ctx_h = _sdpa(q3, k3, v3, kv_tile)                       # (bb, S, Dh) f32
        ctx_scr[:, lo:hi] = ctx_h.reshape(R, head_dim).astype(ctx_scr.dtype)

    # ---- wide output-projection partial (K = G*Dh), accumulate across groups ----
    acc_scr[...] += jnp.dot(ctx_scr[...], wout_ref[0], preferred_element_type=jnp.float32)

    # ---- once per batch block: lane-dense store (H % 128 == 0 in the demo) ----
    @pl.when(g == pl.num_programs(1) - 1)
    def _store():
        o_ref[...] = acc_scr[...].reshape(bb, S, H).astype(o_ref.dtype)

    # TODO(synk): dropout (p=0.1) omitted — module is evaluated in eval mode (identity).
    # TODO(synk): attn_mask / is_causal=True masking not implemented (module defaults
    #             used: attn_mask=None, is_causal=False).
    # TODO(synk): for H % 128 != 0, pad H (or flatten the out block to (bb,1,S*H)) so
    #             the final store stays an unmasked lane-dense vst.


def _pick_head_group(num_heads, head_dim, target_lanes=256):
    """Group enough heads that the QKV-projection N and out-projection K reach ~256
    lanes (fills the v6e/v7x 256-deep MXU; >=128 also fills v5e)."""
    if head_dim >= target_lanes:
        return 1
    g = max(1, min(num_heads, target_lanes // head_dim))
    while num_heads % g:
        g -= 1
    return g


def _pick_batch_block(B, S, target_rows=512):
    """Fold batch rows into the matmul M dimension (target ~512 rows per step).
    No reserved 'parallel' split: on single-TC v5e/v6e it only halves M."""
    bb = max(1, min(B, max(1, target_rows // max(S, 1))))
    while B % bb:
        bb -= 1
    return bb


def prepare_mha_params(w_qkv, w_out, gamma, beta, *, num_heads, group_size):
    """One-time host-side weight prep (hoist out of the per-call path):
    transpose, regroup per head-group, fold 1/sqrt(Dh) into q, cast to bf16."""
    three_h, H = w_qkv.shape
    assert three_h == 3 * H
    Dh = H // num_heads
    NG = num_heads // group_size
    GD = group_size * Dh
    scale = 1.0 / math.sqrt(Dh)

    wt = w_qkv.T                                              # (H, 3H); y = x @ W.T
    wt = jnp.concatenate([wt[:, :H] * scale, wt[:, H:]], axis=1)   # fold scale into q
    # 3H column layout is (part=3, head, Dh) = (3, NG, GD) -> regroup to (NG, H, 3*GD)
    wqkv_groups = jnp.transpose(wt.reshape(H, 3, NG, GD), (2, 0, 1, 3))
    wqkv_groups = wqkv_groups.reshape(NG, H, 3 * GD).astype(jnp.bfloat16)
    wout_groups = w_out.T.reshape(NG, GD, H).astype(jnp.bfloat16)

    gamma2 = gamma.reshape(1, H).astype(jnp.float32)
    beta2 = beta.reshape(1, H).astype(jnp.float32)
    return wqkv_groups, wout_groups, gamma2, beta2


def mha_forward(x, wqkv_groups, wout_groups, gamma2, beta2, *,
                num_heads, group_size, eps=1e-5):
    B, S, H = x.shape
    Dh = H // num_heads
    NG = num_heads // group_size
    GD = group_size * Dh

    bb = _pick_batch_block(B, S)
    R = bb * S
    kv_tile = min(S, 512)

    # Rough per-step VMEM budget (double-buffered IO + weights + scratch), with 2x
    # headroom, clamped to v7x's 64 MiB physical VMEM.
    est = (2 * 2 * R * H * x.dtype.itemsize          # x + out blocks, double-buffered
           + R * H * (2 + 4)                         # ln_scr (bf16) + acc_scr (f32)
           + R * 3 * GD * 2 + R * GD * 2             # qkv_scr + ctx_scr (bf16)
           + 2 * (H * 3 * GD + GD * H) * 2           # weight blocks, double-buffered
           + 4 * bb * S * kv_tile)                   # per-head score block headroom
    vmem_limit = int(min(max(32 * 1024 * 1024, 2 * est), 64 * 1024 * 1024))

    kernel = functools.partial(mha_kernel, head_dim=Dh, group_size=group_size,
                               eps=eps, kv_tile=kv_tile)

    return pl.pallas_call(
        kernel,
        out_shape=jax.ShapeDtypeStruct((B, S, H), x.dtype),
        grid_spec=pltpu.PrefetchScalarGridSpec(
            num_scalar_prefetch=0,
            grid=(B // bb, NG),
            in_specs=[
                pl.BlockSpec((bb, S, H), lambda b, g: (b, 0, 0)),       # x (resident over g)
                pl.BlockSpec((1, H, 3 * GD), lambda b, g: (g, 0, 0)),   # group QKV weights
                pl.BlockSpec((1, GD, H), lambda b, g: (g, 0, 0)),       # group out-proj rows
                pl.BlockSpec((1, H), lambda b, g: (0, 0)),              # LN gamma
                pl.BlockSpec((1, H), lambda b, g: (0, 0)),              # LN beta
            ],
            out_specs=pl.BlockSpec((bb, S, H), lambda b, g: (b, 0, 0)),
            scratch_shapes=[
                pltpu.VMEM((R, H), jnp.bfloat16),        # LN result (persists over groups)
                pltpu.VMEM((R, H), jnp.float32),         # output accumulator (residual+proj)
                pltpu.VMEM((R, 3 * GD), jnp.bfloat16),   # per-group QKV staging
                pltpu.VMEM((R, GD), jnp.bfloat16),       # per-group context staging
            ],
        ),
        compiler_params=pltpu.CompilerParams(
            dimension_semantics=("parallel", "arbitrary"),
            vmem_limit_bytes=vmem_limit,
        ),
    )(x, wqkv_groups, wout_groups, gamma2, beta2)


def multi_head_attention(x, w_qkv, w_out, gamma, beta, *, num_heads, eps=1e-5):
    B, S, H = x.shape
    if H % num_heads != 0:
        raise ValueError("hidden_size must be divisible by num_heads")
    Dh = H // num_heads
    G = _pick_head_group(num_heads, Dh)
    params = prepare_mha_params(w_qkv, w_out, gamma, beta,
                                num_heads=num_heads, group_size=G)
    return mha_forward(x, *params, num_heads=num_heads, group_size=G, eps=eps)


def reference_mha(x, w_qkv, w_out, gamma, beta, *, num_heads, eps=1e-5):
    B, S, H = x.shape
    Dh = H // num_heads
    mean = jnp.mean(x, axis=-1, keepdims=True)
    var = jnp.mean((x - mean) ** 2, axis=-1, keepdims=True)
    ln = (x - mean) / jnp.sqrt(var + eps) * gamma + beta
    qkv = ln @ w_qkv.T                                      # (B, S, 3H)
    qkv = qkv.reshape(B, S, 3, num_heads, Dh)
    q = jnp.transpose(qkv[:, :, 0], (0, 2, 1, 3))           # (B, N, S, Dh)
    k = jnp.transpose(qkv[:, :, 1], (0, 2, 1, 3))
    v = jnp.transpose(qkv[:, :, 2], (0, 2, 1, 3))
    scores = jnp.einsum('bnqd,bnkd->bnqk', q, k) / math.sqrt(Dh)
    p = jax.nn.softmax(scores, axis=-1)
    ctx = jnp.einsum('bnqk,bnkd->bnqd', p, v)
    ctx = jnp.transpose(ctx, (0, 2, 1, 3)).reshape(B, S, H)
    return ctx @ w_out.T + x


def xavier_uniform(key, shape):
    fan_out, fan_in = shape
    bound = math.sqrt(6.0 / (fan_in + fan_out))
    return jax.random.uniform(key, shape, jnp.float32, -bound, bound)


if __name__ == "__main__":
    # H = 128 keeps every block's last dim a multiple of 128 (lane-dense loads/stores).
    B, S, H = 2, 8, 128
    num_heads = 8                     # head_dim = 16

    key = jax.random.PRNGKey(0)
    kx, kqkv, kout = jax.random.split(key, 3)

    x = jax.random.normal(kx, (B, S, H), jnp.float32)
    w_qkv = xavier_uniform(kqkv, (3 * H, H))      # nn.Linear(H, 3H).weight, bias=False
    w_out = xavier_uniform(kout, (H, H))          # nn.Linear(H, H).weight, bias=False
    gamma = jnp.ones((H,), jnp.float32)           # LayerNorm weight
    beta = jnp.zeros((H,), jnp.float32)           # LayerNorm bias

    out = multi_head_attention(x, w_qkv, w_out, gamma, beta, num_heads=num_heads)
    out = jax.block_until_ready(out)

    ref = reference_mha(x, w_qkv, w_out, gamma, beta, num_heads=num_heads)
    # Kernel uses bf16 MXU operands (f32 accumulation) and approx reciprocal, so
    # compare with a bf16-appropriate tolerance against the pure-f32 reference.
    if not bool(jnp.allclose(out, ref, atol=3e-2, rtol=3e-2)):
        raise AssertionError("Pallas kernel output does not match JAX reference")

    print("KERNEL_OK")
</pallas_src>

<mosaic_0001>
module attributes {stable_mosaic.version = 11 : i64} {
  func.func @mha_kernel(%arg0: i32, %arg1: i32, %arg2: memref<2x8x128xf32, #tpu.memory_space<vmem>>, %arg3: memref<1x128x384xbf16, #tpu.memory_space<vmem>>, %arg4: memref<1x128x128xbf16, #tpu.memory_space<vmem>>, %arg5: memref<1x128xf32, #tpu.memory_space<vmem>>, %arg6: memref<1x128xf32, #tpu.memory_space<vmem>>, %arg7: memref<2x8x128xf32, #tpu.memory_space<vmem>>, %arg8: memref<16x128xbf16, #tpu.memory_space<vmem>>, %arg9: memref<16x128xf32, #tpu.memory_space<vmem>>, %arg10: memref<16x384xbf16, #tpu.memory_space<vmem>>, %arg11: memref<16x128xbf16, #tpu.memory_space<vmem>>) attributes {dimension_semantics = [#tpu.dimension_semantics<parallel>, #tpu.dimension_semantics<arbitrary>], iteration_bounds = array<i64: 1, 1>, scalar_prefetch = 0 : i64, scratch_operands = 4 : i64, tpu.core_type = #tpu.core_type<tc>, window_params = [{transform_indices = @transform_0, window_bounds = array<i64: 2, 8, 128>}, {transform_indices = @transform_1, window_bounds = array<i64: 1, 128, 384>}, {transform_indices = @transform_2, window_bounds = array<i64: 1, 128, 128>}, {pipeline_mode = #tpu.pipeline_mode<synchronous>, transform_indices = @transform_3, window_bounds = array<i64: 1, 128>}, {pipeline_mode = #tpu.pipeline_mode<synchronous>, transform_indices = @transform_4, window_bounds = array<i64: 1, 128>}, {transform_indices = @transform_5, window_bounds = array<i64: 2, 8, 128>}]} {
    %c0_i32 = arith.constant 0 : i32
    %0 = arith.cmpi eq, %arg1, %c0_i32 : i32
    %1 = arith.extui %0 : i1 to i32
    %c0_i32_0 = arith.constant 0 : i32
    %2 = arith.cmpi ne, %1, %c0_i32_0 : i32
    scf.if %2 {
      %c0_92 = arith.constant 0 : index
      %c0_93 = arith.constant 0 : index
      %c0_94 = arith.constant 0 : index
      %195 = vector.load %arg2[%c0_92, %c0_93, %c0_94] : memref<2x8x128xf32, #tpu.memory_space<vmem>>, vector<2x8x128xf32>
      %196 = vector.shape_cast %195 : vector<2x8x128xf32> to vector<16x128xf32>
      %cst_95 = arith.constant dense<0.000000e+00> : vector<16xf32>
      %197 = vector.multi_reduction <add>, %196, %cst_95 [1] : vector<16x128xf32> to vector<16xf32>
      %198 = vector.shape_cast %197 : vector<16xf32> to vector<16x1xf32>
      %cst_96 = arith.constant 1.280000e+02 : f32
      %199 = vector.broadcast %cst_96 : f32 to vector<16x1xf32>
      %200 = arith.divf %198, %199 : vector<16x1xf32>
      %201 = vector.broadcast %200 : vector<16x1xf32> to vector<16x128xf32>
      %202 = arith.subf %196, %201 : vector<16x128xf32>
      %203 = arith.mulf %202, %202 : vector<16x128xf32>
      %cst_97 = arith.constant dense<0.000000e+00> : vector<16xf32>
      %204 = vector.multi_reduction <add>, %203, %cst_97 [1] : vector<16x128xf32> to vector<16xf32>
      %205 = vector.shape_cast %204 : vector<16xf32> to vector<16x1xf32>
      %cst_98 = arith.constant 1.280000e+02 : f32
      %206 = vector.broadcast %cst_98 : f32 to vector<16x1xf32>
      %207 = arith.divf %205, %206 : vector<16x1xf32>
      %cst_99 = arith.constant 9.99999974E-6 : f32
      %208 = vector.broadcast %cst_99 : f32 to vector<16x1xf32>
      %209 = arith.addf %207, %208 : vector<16x1xf32>
      %210 = math.rsqrt %209 : vector<16x1xf32>
      %211 = vector.broadcast %210 : vector<16x1xf32> to vector<16x128xf32>
      %212 = arith.mulf %202, %211 : vector<16x128xf32>
      %c0_100 = arith.constant 0 : index
      %c0_101 = arith.constant 0 : index
      %213 = vector.load %arg5[%c0_100, %c0_101] : memref<1x128xf32, #tpu.memory_space<vmem>>, vector<1x128xf32>
      %214 = vector.broadcast %213 : vector<1x128xf32> to vector<16x128xf32>
      %215 = arith.mulf %212, %214 : vector<16x128xf32>
      %c0_102 = arith.constant 0 : index
      %c0_103 = arith.constant 0 : index
      %216 = vector.load %arg6[%c0_102, %c0_103] : memref<1x128xf32, #tpu.memory_space<vmem>>, vector<1x128xf32>
      %217 = vector.broadcast %216 : vector<1x128xf32> to vector<16x128xf32>
      %218 = arith.addf %215, %217 : vector<16x128xf32>
      %219 = arith.truncf %218 : vector<16x128xf32> to vector<16x128xbf16>
      %c0_104 = arith.constant 0 : index
      %c0_105 = arith.constant 0 : index
      %220 = vector.load %arg8[%c0_104, %c0_105] : memref<16x128xbf16, #tpu.memory_space<vmem>>, vector<16x128xbf16>
      tpu.vector_store %arg8[%c0_104, %c0_105], %219 {strides = array<i32>} : memref<16x128xbf16, #tpu.memory_space<vmem>>, vector<16x128xbf16>,
      %c0_106 = arith.constant 0 : index
      %c0_107 = arith.constant 0 : index
      %221 = vector.load %arg9[%c0_106, %c0_107] : memref<16x128xf32, #tpu.memory_space<vmem>>, vector<16x128xf32>
      tpu.vector_store %arg9[%c0_106, %c0_107], %196 {strides = array<i32>} : memref<16x128xf32, #tpu.memory_space<vmem>>, vector<16x128xf32>,
    } else {
    }
    %c0 = arith.constant 0 : index
    %c0_1 = arith.constant 0 : index
    %3 = vector.load %arg8[%c0, %c0_1] : memref<16x128xbf16, #tpu.memory_space<vmem>>, vector<16x128xbf16>
    %c0_2 = arith.constant 0 : index
    %c0_3 = arith.constant 0 : index
    %c0_4 = arith.constant 0 : index
    %4 = vector.load %arg3[%c0_2, %c0_3, %c0_4] : memref<1x128x384xbf16, #tpu.memory_space<vmem>>, vector<1x128x384xbf16>
    %5 = vector.shape_cast %4 : vector<1x128x384xbf16> to vector<128x384xbf16>
    %cst = arith.constant dense<0.000000e+00> : vector<16x384xf32>
    %6 = tpu.matmul %3, %5, %cst {dimension_numbers = #tpu.dot_dimension_numbers<[1], [0], [0], [1], [0, 0, 1, 1], [], []>} : vector<16x128xbf16>, vector<128x384xbf16>, vector<16x384xf32> -> vector<16x384xf32>
    %7 = arith.truncf %6 : vector<16x384xf32> to vector<16x384xbf16>
    %c0_5 = arith.constant 0 : index
    %c0_6 = arith.constant 0 : index
    %8 = vector.load %arg10[%c0_5, %c0_6] : memref<16x384xbf16, #tpu.memory_space<vmem>>, vector<16x384xbf16>
    tpu.vector_store %arg10[%c0_5, %c0_6], %7 {strides = array<i32>} : memref<16x384xbf16, #tpu.memory_space<vmem>>, vector<16x384xbf16>,
    %c0_7 = arith.constant 0 : index
    %c0_8 = arith.constant 0 : index
    %9 = vector.load %arg10[%c0_7, %c0_8] : memref<16x384xbf16, #tpu.memory_space<vmem>>, vector<16x16xbf16>
    %10 = vector.shape_cast %9 : vector<16x16xbf16> to vector<2x8x16xbf16>
    %c0_9 = arith.constant 0 : index
    %c128 = arith.constant 128 : index
    %11 = vector.load %arg10[%c0_9, %c128] : memref<16x384xbf16, #tpu.memory_space<vmem>>, vector<16x16xbf16>
    %12 = vector.shape_cast %11 : vector<16x16xbf16> to vector<2x8x16xbf16>
    %c0_10 = arith.constant 0 : index
    %c256 = arith.constant 256 : index
    %13 = vector.load %arg10[%c0_10, %c256] : memref<16x384xbf16, #tpu.memory_space<vmem>>, vector<16x16xbf16>
    %14 = vector.shape_cast %13 : vector<16x16xbf16> to vector<2x8x16xbf16>
    "tpu.trace_start"() <{level = 10 : i32, message = "bqd,bkd->bqk"}> : () -> ()
    %cst_11 = arith.constant dense<0.000000e+00> : vector<2x8x8xf32>
    %15 = tpu.matmul %10, %12, %cst_11 {dimension_numbers = #tpu.dot_dimension_numbers<[2], [2], [1], [1], [0, 0, 0, 1, 1, 1], [0], [0]>} : vector<2x8x16xbf16>, vector<2x8x16xbf16>, vector<2x8x8xf32> -> vector<2x8x8xf32>
    "tpu.trace_stop"() : () -> ()
    %cst_12 = arith.constant dense<0xFF800000> : vector<2x8xf32>
    %16 = vector.multi_reduction <maximumf>, %15, %cst_12 [2] : vector<2x8x8xf32> to vector<2x8xf32>
    %17 = vector.shape_cast %16 : vector<2x8xf32> to vector<2x8x1xf32>
    %18 = vector.broadcast %17 : vector<2x8x1xf32> to vector<2x8x8xf32>
    %19 = arith.subf %15, %18 : vector<2x8x8xf32>
    %20 = math.exp %19 : vector<2x8x8xf32>
    %cst_13 = arith.constant dense<0.000000e+00> : vector<2x8xf32>
    %21 = vector.multi_reduction <add>, %20, %cst_13 [2] : vector<2x8x8xf32> to vector<2x8xf32>
    %22 = vector.shape_cast %21 : vector<2x8xf32> to vector<2x8x1xf32>
    %23 = tpu.reciprocal %22 {approx = true} : vector<2x8x1xf32> -> vector<2x8x1xf32>
    %24 = vector.broadcast %23 : vector<2x8x1xf32> to vector<2x8x8xf32>
    %25 = arith.mulf %20, %24 : vector<2x8x8xf32>
    %26 = arith.truncf %25 : vector<2x8x8xf32> to vector<2x8x8xbf16>
    "tpu.trace_start"() <{level = 10 : i32, message = "bqk,bkd->bqd"}> : () -> ()
    %cst_14 = arith.constant dense<0.000000e+00> : vector<2x8x16xf32>
    %27 = tpu.matmul %26, %14, %cst_14 {dimension_numbers = #tpu.dot_dimension_numbers<[2], [1], [1], [2], [0, 0, 0, 1, 1, 2], [0], [0]>} : vector<2x8x8xbf16>, vector<2x8x16xbf16>, vector<2x8x16xf32> -> vector<2x8x16xf32>
    "tpu.trace_stop"() : () -> ()
    %28 = vector.shape_cast %27 : vector<2x8x16xf32> to vector<16x16xf32>
    %29 = arith.truncf %28 : vector<16x16xf32> to vector<16x16xbf16>
    %c0_15 = arith.constant 0 : index
    %c0_16 = arith.constant 0 : index
    %30 = vector.load %arg11[%c0_15, %c0_16] : memref<16x128xbf16, #tpu.memory_space<vmem>>, vector<16x16xbf16>
    tpu.vector_store %arg11[%c0_15, %c0_16], %29 {strides = array<i32>} : memref<16x128xbf16, #tpu.memory_space<vmem>>, vector<16x16xbf16>,
    %c0_17 = arith.constant 0 : index
    %c16 = arith.constant 16 : index
    %31 = vector.load %arg10[%c0_17, %c16] : memref<16x384xbf16, #tpu.memory_space<vmem>>, vector<16x16xbf16>
    %32 = vector.shape_cast %31 : vector<16x16xbf16> to vector<2x8x16xbf16>
    %c0_18 = arith.constant 0 : index
    %c144 = arith.constant 144 : index
    %33 = vector.load %arg10[%c0_18, %c144] : memref<16x384xbf16, #tpu.memory_space<vmem>>, vector<16x16xbf16>
    %34 = vector.shape_cast %33 : vector<16x16xbf16> to vector<2x8x16xbf16>
    %c0_19 = arith.constant 0 : index
    %c272 = arith.constant 272 : index
    %35 = vector.load %arg10[%c0_19, %c272] : memref<16x384xbf16, #tpu.memory_space<vmem>>, vector<16x16xbf16>
    %36 = vector.shape_cast %35 : vector<16x16xbf16> to vector<2x8x16xbf16>
    "tpu.trace_start"() <{level = 10 : i32, message = "bqd,bkd->bqk"}> : () -> ()
    %cst_20 = arith.constant dense<0.000000e+00> : vector<2x8x8xf32>
    %37 = tpu.matmul %32, %34, %cst_20 {dimension_numbers = #tpu.dot_dimension_numbers<[2], [2], [1], [1], [0, 0, 0, 1, 1, 1], [0], [0]>} : vector<2x8x16xbf16>, vector<2x8x16xbf16>, vector<2x8x8xf32> -> vector<2x8x8xf32>
    "tpu.trace_stop"() : () -> ()
    %cst_21 = arith.constant dense<0xFF800000> : vector<2x8xf32>
    %38 = vector.multi_reduction <maximumf>, %37, %cst_21 [2] : vector<2x8x8xf32> to vector<2x8xf32>
    %39 = vector.shape_cast %38 : vector<2x8xf32> to vector<2x8x1xf32>
    %40 = vector.broadcast %39 : vector<2x8x1xf32> to vector<2x8x8xf32>
    %41 = arith.subf %37, %40 : vector<2x8x8xf32>
    %42 = math.exp %41 : vector<2x8x8xf32>
    %cst_22 = arith.constant dense<0.000000e+00> : vector<2x8xf32>
    %43 = vector.multi_reduction <add>, %42, %cst_22 [2] : vector<2x8x8xf32> to vector<2x8xf32>
    %44 = vector.shape_cast %43 : vector<2x8xf32> to vector<2x8x1xf32>
    %45 = tpu.reciprocal %44 {approx = true} : vector<2x8x1xf32> -> vector<2x8x1xf32>
    %46 = vector.broadcast %45 : vector<2x8x1xf32> to vector<2x8x8xf32>
    %47 = arith.mulf %42, %46 : vector<2x8x8xf32>
    %48 = arith.truncf %47 : vector<2x8x8xf32> to vector<2x8x8xbf16>
    "tpu.trace_start"() <{level = 10 : i32, message = "bqk,bkd->bqd"}> : () -> ()
    %cst_23 = arith.constant dense<0.000000e+00> : vector<2x8x16xf32>
    %49 = tpu.matmul %48, %36, %cst_23 {dimension_numbers = #tpu.dot_dimension_numbers<[2], [1], [1], [2], [0, 0, 0, 1, 1, 2], [0], [0]>} : vector<2x8x8xbf16>, vector<2x8x16xbf16>, vector<2x8x16xf32> -> vector<2x8x16xf32>
    "tpu.trace_stop"() : () -> ()
    %50 = vector.shape_cast %49 : vector<2x8x16xf32> to vector<16x16xf32>
    %51 = arith.truncf %50 : vector<16x16xf32> to vector<16x16xbf16>
    %c0_24 = arith.constant 0 : index
    %c16_25 = arith.constant 16 : index
    %52 = vector.load %arg11[%c0_24, %c16_25] : memref<16x128xbf16, #tpu.memory_space<vmem>>, vector<16x16xbf16>
    tpu.vector_store %arg11[%c0_24, %c16_25], %51 {strides = array<i32>} : memref<16x128xbf16, #tpu.memory_space<vmem>>, vector<16x16xbf16>,
    %c0_26 = arith.constant 0 : index
    %c32 = arith.constant 32 : index
    %53 = vector.load %arg10[%c0_26, %c32] : memref<16x384xbf16, #tpu.memory_space<vmem>>, vector<16x16xbf16>
    %54 = vector.shape_cast %53 : vector<16x16xbf16> to vector<2x8x16xbf16>
    %c0_27 = arith.constant 0 : index
    %c160 = arith.constant 160 : index
    %55 = vector.load %arg10[%c0_27, %c160] : memref<16x384xbf16, #tpu.memory_space<vmem>>, vector<16x16xbf16>
    %56 = vector.shape_cast %55 : vector<16x16xbf16> to vector<2x8x16xbf16>
    %c0_28 = arith.constant 0 : index
    %c288 = arith.constant 288 : index
    %57 = vector.load %arg10[%c0_28, %c288] : memref<16x384xbf16, #tpu.memory_space<vmem>>, vector<16x16xbf16>
    %58 = vector.shape_cast %57 : vector<16x16xbf16> to vector<2x8x16xbf16>
    "tpu.trace_start"() <{level = 10 : i32, message = "bqd,bkd->bqk"}> : () -> ()
    %cst_29 = arith.constant dense<0.000000e+00> : vector<2x8x8xf32>
    %59 = tpu.matmul %54, %56, %cst_29 {dimension_numbers = #tpu.dot_dimension_numbers<[2], [2], [1], [1], [0, 0, 0, 1, 1, 1], [0], [0]>} : vector<2x8x16xbf16>, vector<2x8x16xbf16>, vector<2x8x8xf32> -> vector<2x8x8xf32>
    "tpu.trace_stop"() : () -> ()
    %cst_30 = arith.constant dense<0xFF800000> : vector<2x8xf32>
    %60 = vector.multi_reduction <maximumf>, %59, %cst_30 [2] : vector<2x8x8xf32> to vector<2x8xf32>
    %61 = vector.shape_cast %60 : vector<2x8xf32> to vector<2x8x1xf32>
    %62 = vector.broadcast %61 : vector<2x8x1xf32> to vector<2x8x8xf32>
    %63 = arith.subf %59, %62 : vector<2x8x8xf32>
    %64 = math.exp %63 : vector<2x8x8xf32>
    %cst_31 = arith.constant dense<0.000000e+00> : vector<2x8xf32>
    %65 = vector.multi_reduction <add>, %64, %cst_31 [2] : vector<2x8x8xf32> to vector<2x8xf32>
    %66 = vector.shape_cast %65 : vector<2x8xf32> to vector<2x8x1xf32>
    %67 = tpu.reciprocal %66 {approx = true} : vector<2x8x1xf32> -> vector<2x8x1xf32>
    %68 = vector.broadcast %67 : vector<2x8x1xf32> to vector<2x8x8xf32>
    %69 = arith.mulf %64, %68 : vector<2x8x8xf32>
    %70 = arith.truncf %69 : vector<2x8x8xf32> to vector<2x8x8xbf16>
    "tpu.trace_start"() <{level = 10 : i32, message = "bqk,bkd->bqd"}> : () -> ()
    %cst_32 = arith.constant dense<0.000000e+00> : vector<2x8x16xf32>
    %71 = tpu.matmul %70, %58, %cst_32 {dimension_numbers = #tpu.dot_dimension_numbers<[2], [1], [1], [2], [0, 0, 0, 1, 1, 2], [0], [0]>} : vector<2x8x8xbf16>, vector<2x8x16xbf16>, vector<2x8x16xf32> -> vector<2x8x16xf32>
    "tpu.trace_stop"() : () -> ()
    %72 = vector.shape_cast %71 : vector<2x8x16xf32> to vector<16x16xf32>
    %73 = arith.truncf %72 : vector<16x16xf32> to vector<16x16xbf16>
    %c0_33 = arith.constant 0 : index
    %c32_34 = arith.constant 32 : index
    %74 = vector.load %arg11[%c0_33, %c32_34] : memref<16x128xbf16, #tpu.memory_space<vmem>>, vector<16x16xbf16>
    tpu.vector_store %arg11[%c0_33, %c32_34], %73 {strides = array<i32>} : memref<16x128xbf16, #tpu.memory_space<vmem>>, vector<16x16xbf16>,
    %c0_35 = arith.constant 0 : index
    %c48 = arith.constant 48 : index
    %75 = vector.load %arg10[%c0_35, %c48] : memref<16x384xbf16, #tpu.memory_space<vmem>>, vector<16x16xbf16>
    %76 = vector.shape_cast %75 : vector<16x16xbf16> to vector<2x8x16xbf16>
    %c0_36 = arith.constant 0 : index
    %c176 = arith.constant 176 : index
    %77 = vector.load %arg10[%c0_36, %c176] : memref<16x384xbf16, #tpu.memory_space<vmem>>, vector<16x16xbf16>
    %78 = vector.shape_cast %77 : vector<16x16xbf16> to vector<2x8x16xbf16>
    %c0_37 = arith.constant 0 : index
    %c304 = arith.constant 304 : index
    %79 = vector.load %arg10[%c0_37, %c304] : memref<16x384xbf16, #tpu.memory_space<vmem>>, vector<16x16xbf16>
    %80 = vector.shape_cast %79 : vector<16x16xbf16> to vector<2x8x16xbf16>
    "tpu.trace_start"() <{level = 10 : i32, message = "bqd,bkd->bqk"}> : () -> ()
    %cst_38 = arith.constant dense<0.000000e+00> : vector<2x8x8xf32>
    %81 = tpu.matmul %76, %78, %cst_38 {dimension_numbers = #tpu.dot_dimension_numbers<[2], [2], [1], [1], [0, 0, 0, 1, 1, 1], [0], [0]>} : vector<2x8x16xbf16>, vector<2x8x16xbf16>, vector<2x8x8xf32> -> vector<2x8x8xf32>
    "tpu.trace_stop"() : () -> ()
    %cst_39 = arith.constant dense<0xFF800000> : vector<2x8xf32>
    %82 = vector.multi_reduction <maximumf>, %81, %cst_39 [2] : vector<2x8x8xf32> to vector<2x8xf32>
    %83 = vector.shape_cast %82 : vector<2x8xf32> to vector<2x8x1xf32>
    %84 = vector.broadcast %83 : vector<2x8x1xf32> to vector<2x8x8xf32>
    %85 = arith.subf %81, %84 : vector<2x8x8xf32>
    %86 = math.exp %85 : vector<2x8x8xf32>
    %cst_40 = arith.constant dense<0.000000e+00> : vector<2x8xf32>
    %87 = vector.multi_reduction <add>, %86, %cst_40 [2] : vector<2x8x8xf32> to vector<2x8xf32>
    %88 = vector.shape_cast %87 : vector<2x8xf32> to vector<2x8x1xf32>
    %89 = tpu.reciprocal %88 {approx = true} : vector<2x8x1xf32> -> vector<2x8x1xf32>
    %90 = vector.broadcast %89 : vector<2x8x1xf32> to vector<2x8x8xf32>
    %91 = arith.mulf %86, %90 : vector<2x8x8xf32>
    %92 = arith.truncf %91 : vector<2x8x8xf32> to vector<2x8x8xbf16>
    "tpu.trace_start"() <{level = 10 : i32, message = "bqk,bkd->bqd"}> : () -> ()
    %cst_41 = arith.constant dense<0.000000e+00> : vector<2x8x16xf32>
    %93 = tpu.matmul %92, %80, %cst_41 {dimension_numbers = #tpu.dot_dimension_numbers<[2], [1], [1], [2], [0, 0, 0, 1, 1, 2], [0], [0]>} : vector<2x8x8xbf16>, vector<2x8x16xbf16>, vector<2x8x16xf32> -> vector<2x8x16xf32>
    "tpu.trace_stop"() : () -> ()
    %94 = vector.shape_cast %93 : vector<2x8x16xf32> to vector<16x16xf32>
    %95 = arith.truncf %94 : vector<16x16xf32> to vector<16x16xbf16>
    %c0_42 = arith.constant 0 : index
    %c48_43 = arith.constant 48 : index
    %96 = vector.load %arg11[%c0_42, %c48_43] : memref<16x128xbf16, #tpu.memory_space<vmem>>, vector<16x16xbf16>
    tpu.vector_store %arg11[%c0_42, %c48_43], %95 {strides = array<i32>} : memref<16x128xbf16, #tpu.memory_space<vmem>>, vector<16x16xbf16>,
    %c0_44 = arith.constant 0 : index
    %c64 = arith.constant 64 : index
    %97 = vector.load %arg10[%c0_44, %c64] : memref<16x384xbf16, #tpu.memory_space<vmem>>, vector<16x16xbf16>
    %98 = vector.shape_cast %97 : vector<16x16xbf16> to vector<2x8x16xbf16>
    %c0_45 = arith.constant 0 : index
    %c192 = arith.constant 192 : index
    %99 = vector.load %arg10[%c0_45, %c192] : memref<16x384xbf16, #tpu.memory_space<vmem>>, vector<16x16xbf16>
    %100 = vector.shape_cast %99 : vector<16x16xbf16> to vector<2x8x16xbf16>
    %c0_46 = arith.constant 0 : index
    %c320 = arith.constant 320 : index
    %101 = vector.load %arg10[%c0_46, %c320] : memref<16x384xbf16, #tpu.memory_space<vmem>>, vector<16x16xbf16>
    %102 = vector.shape_cast %101 : vector<16x16xbf16> to vector<2x8x16xbf16>
    "tpu.trace_start"() <{level = 10 : i32, message = "bqd,bkd->bqk"}> : () -> ()
    %cst_47 = arith.constant dense<0.000000e+00> : vector<2x8x8xf32>
    %103 = tpu.matmul %98, %100, %cst_47 {dimension_numbers = #tpu.dot_dimension_numbers<[2], [2], [1], [1], [0, 0, 0, 1, 1, 1], [0], [0]>} : vector<2x8x16xbf16>, vector<2x8x16xbf16>, vector<2x8x8xf32> -> vector<2x8x8xf32>
    "tpu.trace_stop"() : () -> ()
    %cst_48 = arith.constant dense<0xFF800000> : vector<2x8xf32>
    %104 = vector.multi_reduction <maximumf>, %103, %cst_48 [2] : vector<2x8x8xf32> to vector<2x8xf32>
    %105 = vector.shape_cast %104 : vector<2x8xf32> to vector<2x8x1xf32>
    %106 = vector.broadcast %105 : vector<2x8x1xf32> to vector<2x8x8xf32>
    %107 = arith.subf %103, %106 : vector<2x8x8xf32>
    %108 = math.exp %107 : vector<2x8x8xf32>
    %cst_49 = arith.constant dense<0.000000e+00> : vector<2x8xf32>
    %109 = vector.multi_reduction <add>, %108, %cst_49 [2] : vector<2x8x8xf32> to vector<2x8xf32>
    %110 = vector.shape_cast %109 : vector<2x8xf32> to vector<2x8x1xf32>
    %111 = tpu.reciprocal %110 {approx = true} : vector<2x8x1xf32> -> vector<2x8x1xf32>
    %112 = vector.broadcast %111 : vector<2x8x1xf32> to vector<2x8x8xf32>
    %113 = arith.mulf %108, %112 : vector<2x8x8xf32>
    %114 = arith.truncf %113 : vector<2x8x8xf32> to vector<2x8x8xbf16>
    "tpu.trace_start"() <{level = 10 : i32, message = "bqk,bkd->bqd"}> : () -> ()
    %cst_50 = arith.constant dense<0.000000e+00> : vector<2x8x16xf32>
    %115 = tpu.matmul %114, %102, %cst_50 {dimension_numbers = #tpu.dot_dimension_numbers<[2], [1], [1], [2], [0, 0, 0, 1, 1, 2], [0], [0]>} : vector<2x8x8xbf16>, vector<2x8x16xbf16>, vector<2x8x16xf32> -> vector<2x8x16xf32>
    "tpu.trace_stop"() : () -> ()
    %116 = vector.shape_cast %115 : vector<2x8x16xf32> to vector<16x16xf32>
    %117 = arith.truncf %116 : vector<16x16xf32> to vector<16x16xbf16>
    %c0_51 = arith.constant 0 : index
    %c64_52 = arith.constant 64 : index
    %118 = vector.load %arg11[%c0_51, %c64_52] : memref<16x128xbf16, #tpu.memory_space<vmem>>, vector<16x16xbf16>
    tpu.vector_store %arg11[%c0_51, %c64_52], %117 {strides = array<i32>} : memref<16x128xbf16, #tpu.memory_space<vmem>>, vector<16x16xbf16>,
    %c0_53 = arith.constant 0 : index
    %c80 = arith.constant 80 : index
    %119 = vector.load %arg10[%c0_53, %c80] : memref<16x384xbf16, #tpu.memory_space<vmem>>, vector<16x16xbf16>
    %120 = vector.shape_cast %119 : vector<16x16xbf16> to vector<2x8x16xbf16>
    %c0_54 = arith.constant 0 : index
    %c208 = arith.constant 208 : index
    %121 = vector.load %arg10[%c0_54, %c208] : memref<16x384xbf16, #tpu.memory_space<vmem>>, vector<16x16xbf16>
    %122 = vector.shape_cast %121 : vector<16x16xbf16> to vector<2x8x16xbf16>
    %c0_55 = arith.constant 0 : index
    %c336 = arith.constant 336 : index
    %123 = vector.load %arg10[%c0_55, %c336] : memref<16x384xbf16, #tpu.memory_space<vmem>>, vector<16x16xbf16>
    %124 = vector.shape_cast %123 : vector<16x16xbf16> to vector<2x8x16xbf16>
    "tpu.trace_start"() <{level = 10 : i32, message = "bqd,bkd->bqk"}> : () -> ()
    %cst_56 = arith.constant dense<0.000000e+00> : vector<2x8x8xf32>
    %125 = tpu.matmul %120, %122, %cst_56 {dimension_numbers = #tpu.dot_dimension_numbers<[2], [2], [1], [1], [0, 0, 0, 1, 1, 1], [0], [0]>} : vector<2x8x16xbf16>, vector<2x8x16xbf16>, vector<2x8x8xf32> -> vector<2x8x8xf32>
    "tpu.trace_stop"() : () -> ()
    %cst_57 = arith.constant dense<0xFF800000> : vector<2x8xf32>
    %126 = vector.multi_reduction <maximumf>, %125, %cst_57 [2] : vector<2x8x8xf32> to vector<2x8xf32>
    %127 = vector.shape_cast %126 : vector<2x8xf32> to vector<2x8x1xf32>
    %128 = vector.broadcast %127 : vector<2x8x1xf32> to vector<2x8x8xf32>
    %129 = arith.subf %125, %128 : vector<2x8x8xf32>
    %130 = math.exp %129 : vector<2x8x8xf32>
    %cst_58 = arith.constant dense<0.000000e+00> : vector<2x8xf32>
    %131 = vector.multi_reduction <add>, %130, %cst_58 [2] : vector<2x8x8xf32> to vector<2x8xf32>
    %132 = vector.shape_cast %131 : vector<2x8xf32> to vector<2x8x1xf32>
    %133 = tpu.reciprocal %132 {approx = true} : vector<2x8x1xf32> -> vector<2x8x1xf32>
    %134 = vector.broadcast %133 : vector<2x8x1xf32> to vector<2x8x8xf32>
    %135 = arith.mulf %130, %134 : vector<2x8x8xf32>
    %136 = arith.truncf %135 : vector<2x8x8xf32> to vector<2x8x8xbf16>
    "tpu.trace_start"() <{level = 10 : i32, message = "bqk,bkd->bqd"}> : () -> ()
    %cst_59 = arith.constant dense<0.000000e+00> : vector<2x8x16xf32>
    %137 = tpu.matmul %136, %124, %cst_59 {dimension_numbers = #tpu.dot_dimension_numbers<[2], [1], [1], [2], [0, 0, 0, 1, 1, 2], [0], [0]>} : vector<2x8x8xbf16>, vector<2x8x16xbf16>, vector<2x8x16xf32> -> vector<2x8x16xf32>
    "tpu.trace_stop"() : () -> ()
    %138 = vector.shape_cast %137 : vector<2x8x16xf32> to vector<16x16xf32>
    %139 = arith.truncf %138 : vector<16x16xf32> to vector<16x16xbf16>
    %c0_60 = arith.constant 0 : index
    %c80_61 = arith.constant 80 : index
    %140 = vector.load %arg11[%c0_60, %c80_61] : memref<16x128xbf16, #tpu.memory_space<vmem>>, vector<16x16xbf16>
    tpu.vector_store %arg11[%c0_60, %c80_61], %139 {strides = array<i32>} : memref<16x128xbf16, #tpu.memory_space<vmem>>, vector<16x16xbf16>,
    %c0_62 = arith.constant 0 : index
    %c96 = arith.constant 96 : index
    %141 = vector.load %arg10[%c0_62, %c96] : memref<16x384xbf16, #tpu.memory_space<vmem>>, vector<16x16xbf16>
    %142 = vector.shape_cast %141 : vector<16x16xbf16> to vector<2x8x16xbf16>
    %c0_63 = arith.constant 0 : index
    %c224 = arith.constant 224 : index
    %143 = vector.load %arg10[%c0_63, %c224] : memref<16x384xbf16, #tpu.memory_space<vmem>>, vector<16x16xbf16>
    %144 = vector.shape_cast %143 : vector<16x16xbf16> to vector<2x8x16xbf16>
    %c0_64 = arith.constant 0 : index
    %c352 = arith.constant 352 : index
    %145 = vector.load %arg10[%c0_64, %c352] : memref<16x384xbf16, #tpu.memory_space<vmem>>, vector<16x16xbf16>
    %146 = vector.shape_cast %145 : vector<16x16xbf16> to vector<2x8x16xbf16>
    "tpu.trace_start"() <{level = 10 : i32, message = "bqd,bkd->bqk"}> : () -> ()
    %cst_65 = arith.constant dense<0.000000e+00> : vector<2x8x8xf32>
    %147 = tpu.matmul %142, %144, %cst_65 {dimension_numbers = #tpu.dot_dimension_numbers<[2], [2], [1], [1], [0, 0, 0, 1, 1, 1], [0], [0]>} : vector<2x8x16xbf16>, vector<2x8x16xbf16>, vector<2x8x8xf32> -> vector<2x8x8xf32>
    "tpu.trace_stop"() : () -> ()
    %cst_66 = arith.constant dense<0xFF800000> : vector<2x8xf32>
    %148 = vector.multi_reduction <maximumf>, %147, %cst_66 [2] : vector<2x8x8xf32> to vector<2x8xf32>
    %149 = vector.shape_cast %148 : vector<2x8xf32> to vector<2x8x1xf32>
    %150 = vector.broadcast %149 : vector<2x8x1xf32> to vector<2x8x8xf32>
    %151 = arith.subf %147, %150 : vector<2x8x8xf32>
    %152 = math.exp %151 : vector<2x8x8xf32>
    %cst_67 = arith.constant dense<0.000000e+00> : vector<2x8xf32>
    %153 = vector.multi_reduction <add>, %152, %cst_67 [2] : vector<2x8x8xf32> to vector<2x8xf32>
    %154 = vector.shape_cast %153 : vector<2x8xf32> to vector<2x8x1xf32>
    %155 = tpu.reciprocal %154 {approx = true} : vector<2x8x1xf32> -> vector<2x8x1xf32>
    %156 = vector.broadcast %155 : vector<2x8x1xf32> to vector<2x8x8xf32>
    %157 = arith.mulf %152, %156 : vector<2x8x8xf32>
    %158 = arith.truncf %157 : vector<2x8x8xf32> to vector<2x8x8xbf16>
    "tpu.trace_start"() <{level = 10 : i32, message = "bqk,bkd->bqd"}> : () -> ()
    %cst_68 = arith.constant dense<0.000000e+00> : vector<2x8x16xf32>
    %159 = tpu.matmul %158, %146, %cst_68 {dimension_numbers = #tpu.dot_dimension_numbers<[2], [1], [1], [2], [0, 0, 0, 1, 1, 2], [0], [0]>} : vector<2x8x8xbf16>, vector<2x8x16xbf16>, vector<2x8x16xf32> -> vector<2x8x16xf32>
    "tpu.trace_stop"() : () -> ()
    %160 = vector.shape_cast %159 : vector<2x8x16xf32> to vector<16x16xf32>
    %161 = arith.truncf %160 : vector<16x16xf32> to vector<16x16xbf16>
    %c0_69 = arith.constant 0 : index
    %c96_70 = arith.constant 96 : index
    %162 = vector.load %arg11[%c0_69, %c96_70] : memref<16x128xbf16, #tpu.memory_space<vmem>>, vector<16x16xbf16>
    tpu.vector_store %arg11[%c0_69, %c96_70], %161 {strides = array<i32>} : memref<16x128xbf16, #tpu.memory_space<vmem>>, vector<16x16xbf16>,
    %c0_71 = arith.constant 0 : index
    %c112 = arith.constant 112 : index
    %163 = vector.load %arg10[%c0_71, %c112] : memref<16x384xbf16, #tpu.memory_space<vmem>>, vector<16x16xbf16>
    %164 = vector.shape_cast %163 : vector<16x16xbf16> to vector<2x8x16xbf16>
    %c0_72 = arith.constant 0 : index
    %c240 = arith.constant 240 : index
    %165 = vector.load %arg10[%c0_72, %c240] : memref<16x384xbf16, #tpu.memory_space<vmem>>, vector<16x16xbf16>
    %166 = vector.shape_cast %165 : vector<16x16xbf16> to vector<2x8x16xbf16>
    %c0_73 = arith.constant 0 : index
    %c368 = arith.constant 368 : index
    %167 = vector.load %arg10[%c0_73, %c368] : memref<16x384xbf16, #tpu.memory_space<vmem>>, vector<16x16xbf16>
    %168 = vector.shape_cast %167 : vector<16x16xbf16> to vector<2x8x16xbf16>
    "tpu.trace_start"() <{level = 10 : i32, message = "bqd,bkd->bqk"}> : () -> ()
    %cst_74 = arith.constant dense<0.000000e+00> : vector<2x8x8xf32>
    %169 = tpu.matmul %164, %166, %cst_74 {dimension_numbers = #tpu.dot_dimension_numbers<[2], [2], [1], [1], [0, 0, 0, 1, 1, 1], [0], [0]>} : vector<2x8x16xbf16>, vector<2x8x16xbf16>, vector<2x8x8xf32> -> vector<2x8x8xf32>
    "tpu.trace_stop"() : () -> ()
    %cst_75 = arith.constant dense<0xFF800000> : vector<2x8xf32>
    %170 = vector.multi_reduction <maximumf>, %169, %cst_75 [2] : vector<2x8x8xf32> to vector<2x8xf32>
    %171 = vector.shape_cast %170 : vector<2x8xf32> to vector<2x8x1xf32>
    %172 = vector.broadcast %171 : vector<2x8x1xf32> to vector<2x8x8xf32>
    %173 = arith.subf %169, %172 : vector<2x8x8xf32>
    %174 = math.exp %173 : vector<2x8x8xf32>
    %cst_76 = arith.constant dense<0.000000e+00> : vector<2x8xf32>
    %175 = vector.multi_reduction <add>, %174, %cst_76 [2] : vector<2x8x8xf32> to vector<2x8xf32>
    %176 = vector.shape_cast %175 : vector<2x8xf32> to vector<2x8x1xf32>
    %177 = tpu.reciprocal %176 {approx = true} : vector<2x8x1xf32> -> vector<2x8x1xf32>
    %178 = vector.broadcast %177 : vector<2x8x1xf32> to vector<2x8x8xf32>
    %179 = arith.mulf %174, %178 : vector<2x8x8xf32>
    %180 = arith.truncf %179 : vector<2x8x8xf32> to vector<2x8x8xbf16>
    "tpu.trace_start"() <{level = 10 : i32, message = "bqk,bkd->bqd"}> : () -> ()
    %cst_77 = arith.constant dense<0.000000e+00> : vector<2x8x16xf32>
    %181 = tpu.matmul %180, %168, %cst_77 {dimension_numbers = #tpu.dot_dimension_numbers<[2], [1], [1], [2], [0, 0, 0, 1, 1, 2], [0], [0]>} : vector<2x8x8xbf16>, vector<2x8x16xbf16>, vector<2x8x16xf32> -> vector<2x8x16xf32>
    "tpu.trace_stop"() : () -> ()
    %182 = vector.shape_cast %181 : vector<2x8x16xf32> to vector<16x16xf32>
    %183 = arith.truncf %182 : vector<16x16xf32> to vector<16x16xbf16>
    %c0_78 = arith.constant 0 : index
    %c112_79 = arith.constant 112 : index
    %184 = vector.load %arg11[%c0_78, %c112_79] : memref<16x128xbf16, #tpu.memory_space<vmem>>, vector<16x16xbf16>
    tpu.vector_store %arg11[%c0_78, %c112_79], %183 {strides = array<i32>} : memref<16x128xbf16, #tpu.memory_space<vmem>>, vector<16x16xbf16>,
    %c0_80 = arith.constant 0 : index
    %c0_81 = arith.constant 0 : index
    %185 = vector.load %arg9[%c0_80, %c0_81] : memref<16x128xf32, #tpu.memory_space<vmem>>, vector<16x128xf32>
    %c0_82 = arith.constant 0 : index
    %c0_83 = arith.constant 0 : index
    %186 = vector.load %arg11[%c0_82, %c0_83] : memref<16x128xbf16, #tpu.memory_space<vmem>>, vector<16x128xbf16>
    %c0_84 = arith.constant 0 : index
    %c0_85 = arith.constant 0 : index
    %c0_86 = arith.constant 0 : index
    %187 = vector.load %arg4[%c0_84, %c0_85, %c0_86] : memref<1x128x128xbf16, #tpu.memory_space<vmem>>, vector<1x128x128xbf16>
    %188 = vector.shape_cast %187 : vector<1x128x128xbf16> to vector<128x128xbf16>
    %cst_87 = arith.constant dense<0.000000e+00> : vector<16x128xf32>
    %189 = tpu.matmul %186, %188, %cst_87 {dimension_numbers = #tpu.dot_dimension_numbers<[1], [0], [0], [1], [0, 0, 1, 1], [], []>} : vector<16x128xbf16>, vector<128x128xbf16>, vector<16x128xf32> -> vector<16x128xf32>
    %190 = arith.addf %185, %189 : vector<16x128xf32>
    %c0_88 = arith.constant 0 : index
    %c0_89 = arith.constant 0 : index
    %191 = vector.load %arg9[%c0_88, %c0_89] : memref<16x128xf32, #tpu.memory_space<vmem>>, vector<16x128xf32>
    tpu.vector_store %arg9[%c0_88, %c0_89], %190 {strides = array<i32>} : memref<16x128xf32, #tpu.memory_space<vmem>>, vector<16x128xf32>,
    %c0_i32_90 = arith.constant 0 : i32
    %192 = arith.cmpi eq, %arg1, %c0_i32_90 : i32
    %193 = arith.extui %192 : i1 to i32
    %c0_i32_91 = arith.constant 0 : i32
    %194 = arith.cmpi ne, %193, %c0_i32_91 : i32
    scf.if %194 {
      %c0_92 = arith.constant 0 : index
      %c0_93 = arith.constant 0 : index
      %195 = vector.load %arg9[%c0_92, %c0_93] : memref<16x128xf32, #tpu.memory_space<vmem>>, vector<16x128xf32>
      %196 = vector.shape_cast %195 : vector<16x128xf32> to vector<2x8x128xf32>
      %c0_94 = arith.constant 0 : index
      %c0_95 = arith.constant 0 : index
      %c0_96 = arith.constant 0 : index
      %197 = vector.load %arg7[%c0_94, %c0_95, %c0_96] : memref<2x8x128xf32, #tpu.memory_space<vmem>>, vector<2x8x128xf32>
      tpu.vector_store %arg7[%c0_94, %c0_95, %c0_96], %196 {strides = array<i32>} : memref<2x8x128xf32, #tpu.memory_space<vmem>>, vector<2x8x128xf32>,
    } else {
    }
    return
  }
  func.func @transform_0(%arg0: i32, %arg1: i32) -> (i32, i32, i32) {
    %c0_i32 = arith.constant 0 : i32
    %c0_i32_0 = arith.constant 0 : i32
    %c0_i32_1 = arith.constant 0 : i32
    return %arg0, %c0_i32, %c0_i32_0 : i32, i32, i32
  }
  func.func @transform_1(%arg0: i32, %arg1: i32) -> (i32, i32, i32) {
    %c0_i32 = arith.constant 0 : i32
    %c0_i32_0 = arith.constant 0 : i32
    %c0_i32_1 = arith.constant 0 : i32
    return %arg1, %c0_i32, %c0_i32_0 : i32, i32, i32
  }
  func.func @transform_2(%arg0: i32, %arg1: i32) -> (i32, i32, i32) {
    %c0_i32 = arith.constant 0 : i32
    %c0_i32_0 = arith.constant 0 : i32
    %c0_i32_1 = arith.constant 0 : i32
    return %arg1, %c0_i32, %c0_i32_0 : i32, i32, i32
  }
  func.func @transform_3(%arg0: i32, %arg1: i32) -> (i32, i32) {
    %c0_i32 = arith.constant 0 : i32
    %c0_i32_0 = arith.constant 0 : i32
    %c0_i32_1 = arith.constant 0 : i32
    return %c0_i32, %c0_i32_0 : i32, i32
  }
  func.func @transform_4(%arg0: i32, %arg1: i32) -> (i32, i32) {
    %c0_i32 = arith.constant 0 : i32
    %c0_i32_0 = arith.constant 0 : i32
    %c0_i32_1 = arith.constant 0 : i32
    return %c0_i32, %c0_i32_0 : i32, i32
  }
  func.func @transform_5(%arg0: i32, %arg1: i32) -> (i32, i32, i32) {
    %c0_i32 = arith.constant 0 : i32
    %c0_i32_0 = arith.constant 0 : i32
    %c0_i32_1 = arith.constant 0 : i32
    return %arg0, %c0_i32, %c0_i32_0 : i32, i32, i32
  }
}

</mosaic_0001>

<bundles_post_ra>
// kernel: tpu_custom_call.1
= control target key start
LH: loop header
LB: loop body
LE: loop exit
PB: predicated region body
PF: predicated region fallthrough
CT: control target
= control target key end

     0   :  { %10 = vsyncpa [#allocation7], 0  ;;  %s3593_s0 = inlined_call_operand.hbm [shape: f32[2,8,128], index: 0, kind: input, shape index: {}]   ;;  %s3594_s1 = inlined_call_operand.hbm [shape: bf16[1,128,384], index: 1, kind: input, shape index: {}]   ;;  %s3595_s2 = inlined_call_operand.hbm [shape: bf16[1,128,128], index: 2, kind: input, shape index: {}]   ;;  %s3596_s3 = inlined_call_operand.vmem [shape: f32[1,128], index: 3, kind: input, shape index: {}]   ;;  %s3597_s4 = inlined_call_operand.vmem [shape: f32[1,128], index: 4, kind: input, shape index: {}]   ;;  %s3598_s5 = inlined_call_operand.hbm [shape: f32[2,8,128], index: 5, kind: output, shape index: {}]  }
   0x1   :  { %11 = vsyncpa [#allocation10], 0 }
   0x2   :  { %12 = vsyncpa [#allocation8], 0  ;;  %s3105_s18 = smov [#allocation9]   ;;  %s3011_s22 = scalar_lea.hbm %s3594_s1, 3072 }
   0x3   :  { %s30_s19 = sshll.u32 %s3105_s18, 4  ;;  %p3012_p0 = scmp.ne.s32.totalorder %s3594_s1, %s3011_s22  ;;  %s31_s19 = int_to_ptr.vmem [resolvable:$true] %s30_s19 }
   0x4   :  { %p3015_p1 = scmp.lt.u32.totalorder %s3011_s22, %s3594_s1 }
   0x6   :  { %p3017_p2 = pnand %p3015_p1, %p3012_p0 }
   0x8   :  { %3020 = shalt.err (!%p3017_p2)
}
   0x9   :  { %s3021_s27 = scalar_lea.vmem %s31_s19, 3072  ;;  %p3026_p4 = scmp.lt.s32.totalorder %s31_s19, %s31_s19 }
   0xa   :  { %p3022_p3 = scmp.ne.s32.totalorder %s31_s19, %s3021_s27  ;;  %p3027_p5 = scmp.lt.s32.totalorder %s3021_s27, %s3021_s27 }
   0xc   :  { %p3028_p6 = por %p3027_p5, %p3026_p4 }
   0xe   :  { %p3029_p7 = pnand %p3028_p6, %p3022_p3 }
  0x10   :  { %3032 = shalt.err (!%p3029_p7)
}
  0x11   :  { %s3106_s28 = smov 192   ;;  %s3107_s29 = smov 12  }
  0x12   :  { %36 = dma.hbm_to_vmem [thread:$0]  %s3594_s1, 3072, %s31_s19, [#allocation10], %s3106_s28, %s3106_s28, %s3107_s29  }
  0x13   :  { %s3108_s7 = smov [#allocation6]   ;;  %s3033_s11 = scalar_lea.hbm %s3593_s0, 256 }
  0x14   :  { %s18_s8 = sshll.u32 %s3108_s7, 4  ;;  %p3034_p8 = scmp.ne.s32.totalorder %s3593_s0, %s3033_s11  ;;  %s19_s8 = int_to_ptr.vmem [resolvable:$true] %s18_s8 }
  0x15   :  { %p3037_p9 = scmp.lt.u32.totalorder %s3033_s11, %s3593_s0 }
  0x17   :  { %p3039_p10 = pnand %p3037_p9, %p3034_p8 }
  0x19   :  { %3042 = shalt.err (!%p3039_p10)
}
  0x1a   :  { %s3043_s16 = scalar_lea.vmem %s19_s8, 256  ;;  %p3048_p12 = scmp.lt.s32.totalorder %s19_s8, %s19_s8 }
  0x1b   :  { %p3044_p11 = scmp.ne.s32.totalorder %s19_s8, %s3043_s16  ;;  %p3049_p13 = scmp.lt.s32.totalorder %s3043_s16, %s3043_s16 }
  0x1d   :  { %p3050_p0 = por %p3049_p13, %p3048_p12 }
  0x1f   :  { %p3051_p1 = pnand %p3050_p0, %p3044_p11 }
  0x21   :  { %3054 = shalt.err (!%p3051_p1)
}
  0x22   :  { %s3109_s1 = smov 128   ;;  %s3110_s17 = smov 8  }
  0x23   :  { %24 = dma.hbm_to_vmem [thread:$0]  %s3593_s0, 256, %s19_s8, [#allocation7], %s3109_s1, %s3109_s1, %s3110_s17  }
  0x24   :  { %s3111_s20 = smov [#allocation11]   ;;  %s3055_s24 = scalar_lea.hbm %s3595_s2, 1024 }
  0x25   :  { %s42_s21 = sshll.u32 %s3111_s20, 4  ;;  %p3056_p2 = scmp.ne.s32.totalorder %s3595_s2, %s3055_s24  ;;  %s43_s21 = int_to_ptr.vmem [resolvable:$true] %s42_s21 }
  0x26   :  { %p3059_p3 = scmp.lt.u32.totalorder %s3055_s24, %s3595_s2 }
  0x28   :  { %p3061_p4 = pnand %p3059_p3, %p3056_p2 }
  0x2a   :  { %3064 = shalt.err (!%p3061_p4)
}
  0x2b   :  { %s3065_s29 = scalar_lea.vmem %s43_s21, 1024  ;;  %p3070_p6 = scmp.lt.s32.totalorder %s43_s21, %s43_s21 }
  0x2c   :  { %p3066_p5 = scmp.ne.s32.totalorder %s43_s21, %s3065_s29  ;;  %p3071_p7 = scmp.lt.s32.totalorder %s3065_s29, %s3065_s29 }
  0x2e   :  { %p3072_p8 = por %p3071_p7, %p3070_p6 }
  0x30   :  { %p3073_p9 = pnand %p3072_p8, %p3066_p5 }
  0x32   :  { %3076 = shalt.err (!%p3073_p9)
}
  0x33   :  { %s3112_s0 = smov 64   ;;  %s3113_s30 = smov 4  }
  0x34   :  { %48 = dma.hbm_to_vmem [thread:$0]  %s3595_s2, 1024, %s43_s21, [#allocation10], %s3112_s0, %s3112_s0, %s3113_s30  }
  0x35   :  { %3099 = dma.done.wait [#allocation7], 256  }
  0x36   :  { %3100 = vsyncadd [#allocation7], 4294967040 }
  0x37   :  { %3101 = dma.done.wait [#allocation10], 4096  }
  0x38   :  { %3102 = vsyncadd [#allocation10], 4294963200  ;;  %v67_v0 = vld [vmem:[#allocation6] sm:$0xff]  ;;  %v68_v1 = vld [vmem:[#allocation6 + $0x8] sm:$0xff]  ;;  %v3114_v4 = vmov 0.0   ;;  %v3115_v30 = vmov 0  }
  0x39   :  { %69 = vadd.xlane.f32.xlu0 %v67_v0  ;;  %v2901_v2 = vld [vmem:[#allocation9 + $0x4] ss:$12 sps:$4 sm:$0xff]   ;;  %v2903_v3 = vld [vmem:[#allocation9] ss:$12 sps:$4 sm:$0xff]   ;;  %2650 = vmatprep.subr.bf16.mxu1 %v3114_v4  ;;  %v2904_v5 = vld [vmem:[#allocation9 + $0x8] ss:$12 sps:$4 sm:$0xff]  }
  0x3a   :  { %v2905_v6 = vld [vmem:[#allocation9 + $0x1c] ss:$12 sps:$4 sm:$0xff]   ;;  %275 = vmatprep.subr.bf16.mxu0 %v2901_v2  ;;  %2651 = vmatpush3.bf16.msra.mxu1 %v2904_v5  ;;  %v2907_v15 = vld [vmem:[#allocation9 + $0x18] ss:$12 sps:$4 sm:$0xff]   ;;  %v2908_v16 = vld [vmem:[#allocation9 + $0x20] ss:$12 sps:$4 sm:$0xff]  }
  0x3b   :  { %276 = vmatpush1.bf16.msra.mxu0 %v2903_v3  ;;  %2652 = vmatprep.subr.bf16.mxu1 %v3114_v4  ;;  %v2909_v17 = vld [vmem:[#allocation9 + $0x34] ss:$12 sps:$4 sm:$0xff]   ;;  %v2911_v18 = vld [vmem:[#allocation9 + $0x30] ss:$12 sps:$4 sm:$0xff]   ;;  %v2912_v19 = vld [vmem:[#allocation9 + $0x38] ss:$12 sps:$4 sm:$0xff]  }
  0x3c   :  { %277 = vmatprep.subr.bf16.mxu0 %v2905_v6  ;;  %v2913_v20 = vld [vmem:[#allocation9 + $0x4c] ss:$12 sps:$4 sm:$0xff]   ;;  %v2915_v21 = vld [vmem:[#allocation9 + $0x48] ss:$12 sps:$4 sm:$0xff]   ;;  %v2916_v22 = vld [vmem:[#allocation9 + $0x50] ss:$12 sps:$4 sm:$0xff]   ;;  %307 = vmatprep.mubr.bf16.mxu0 %v3115_v30 }
  0x3d   :  { %71 = vadd.xlane.f32.xlu0 %v68_v1  ;;  %v2917_v23 = vld [vmem:[#allocation9 + $0x64] ss:$12 sps:$4 sm:$0xff]   ;;  %v2919_v24 = vld [vmem:[#allocation9 + $0x60] ss:$12 sps:$4 sm:$0xff]   ;;  %v2920_v25 = vld [vmem:[#allocation9 + $0x68] ss:$12 sps:$4 sm:$0xff]  }
  0x3e   :  { %2653 = vmatpush3.bf16.msra.mxu1 %v2908_v16  ;;  %v2921_v26 = vld [vmem:[#allocation9 + $0x7c] ss:$12 sps:$4 sm:$0xff]   ;;  %v2923_v27 = vld [vmem:[#allocation9 + $0x78] ss:$12 sps:$4 sm:$0xff]   ;;  %v2924_v28 = vld [vmem:[#allocation9 + $0x80] ss:$12 sps:$4 sm:$0xff]  }
  0x3f   :  { %278 = vmatpush1.bf16.msra.mxu0 %v2907_v15  ;;  %2654 = vmatprep.subr.bf16.mxu1 %v3114_v4  ;;  %v2925_v29 = vld [vmem:[#allocation9 + $0x94] ss:$12 sps:$4 sm:$0xff]   ;;  %vm3116_vm0 = vmmov 0   ;;  %v2927_v31 = vld [vmem:[#allocation9 + $0x90] ss:$12 sps:$4 sm:$0xff]   ;;  %vm383_vm1 = vcmask 130048  }
  0x40   :  { %279 = vmatprep.subr.bf16.mxu0 %v2909_v17  ;;  %2666 = vmatprep.mubr.msk.bf16.mxu1 %vm3116_vm0, %v3114_v4  ;;  %v2928_v32 = vld [vmem:[#allocation9 + $0x98] ss:$12 sps:$4 sm:$0xff]   ;;  %v2931_v34 = vld [vmem:[#allocation9 + $0xa8] ss:$12 sps:$4 sm:$0xff]   ;;  %v2932_v35 = vld [vmem:[#allocation9 + $0xb0] ss:$12 sps:$4 sm:$0xff]  }
  0x41   :  { %v2929_v33 = vld [vmem:[#allocation9 + $0xac] ss:$12 sps:$4 sm:$0xff]   ;;  %v2448_v44 = vld [vmem:[%s3596_s3] ss:$0 sm:$0xff]  ;;  %vm504_vm2 = vcmask 1043456   ;;  %vm476_vm3 = vcmask 64512  }
  0x42   :  { %2655 = vmatpush3.bf16.msra.mxu1 %v2912_v19  ;;  %v2449_v48 = vld [vmem:[%s3597_s4] ss:$0 sm:$0xff]  ;;  %s3117_s3 = smov 112   ;;  %s3118_s4 = smov 96   ;;  %vm839_vm4 = vcmask 261248   ;;  %vm1084_vm5 = vcmask 392448  }
  0x43   :  { %280 = vmatpush1.bf16.msra.mxu0 %v2911_v18  ;;  %2656 = vmatprep.subr.bf16.mxu1 %v3114_v4  ;;  %s3119_s11 = smov 80   ;;  %s3120_s12 = smov 48   ;;  %vm1329_vm6 = vcmask 523648   ;;  %vm1574_vm7 = vcmask 654848   ;;  %vm1819_vm8 = vcmask 786048   ;;  %vm2064_vm9 = vcmask 917248  }
  0x44   :  { %281 = vmatprep.subr.bf16.mxu0 %v2913_v20  ;;  %s3121_s13 = smov 32   ;;  %s3122_s14 = smov 16   ;;  %vm2309_vm10 = vcmask 1048448  }
  0x45   :  { %s3123_s15 = smov [#allocation12]  }
  0x46   :  { %2657 = vmatpush3.bf16.msra.mxu1 %v2916_v22  ;;  %s2435_s16 = sshll.u32 %s3123_s15, 4  ;;  %s2436_s16 = int_to_ptr.vmem [resolvable:$true] %s2435_s16 }
  0x47   :  { %282 = vmatpush1.bf16.msra.mxu0 %v2915_v21  ;;  %2658 = vmatprep.subr.bf16.mxu1 %v3114_v4  ;;  %s3077_s18 = scalar_lea.vmem %s2436_s16, 256  ;;  %p3082_p11 = scmp.lt.s32.totalorder %s2436_s16, %s2436_s16 }
  0x48   :  { %283 = vmatprep.subr.bf16.mxu0 %v2917_v23  ;;  %p3078_p10 = scmp.ne.s32.totalorder %s2436_s16, %s3077_s18  ;;  %p3083_p12 = scmp.lt.s32.totalorder %s3077_s18, %s3077_s18 }
  0x4a   :  { %2659 = vmatpush3.bf16.msra.mxu1 %v2920_v25  ;;  %p3084_p13 = por %p3083_p12, %p3082_p11 }
  0x4b   :  { %284 = vmatpush1.bf16.msra.mxu0 %v2919_v24  ;;  %2660 = vmatprep.subr.bf16.mxu1 %v3114_v4 }
  0x4c   :  { %285 = vmatprep.subr.bf16.mxu0 %v2921_v26  ;;  %p3085_p0 = pnand %p3084_p13, %p3078_p10 }
  0x4e   :  { %2661 = vmatpush3.bf16.msra.mxu1 %v2924_v28 }
  0x4f   :  { %286 = vmatpush1.bf16.msra.mxu0 %v2923_v27  ;;  %2662 = vmatprep.subr.bf16.mxu1 %v3114_v4 }
  0x50   :  { %287 = vmatprep.subr.bf16.mxu0 %v2925_v29 }
  0x52   :  { %2663 = vmatpush3.bf16.msra.mxu1 %v2928_v32 }
  0x53   :  { %288 = vmatpush1.bf16.msra.mxu0 %v2927_v31  ;;  %2664 = vmatprep.subr.bf16.mxu1 %v3114_v4 }
  0x54   :  { %289 = vmatprep.subr.bf16.mxu0 %v2929_v33 }
  0x56   :  { %2665 = vmatpush3.bf16.msra.mxu1 %v2932_v35 }
  0x57   :  { %290 = vmatpush1.bf16.msra.mxu0 %v2931_v34  ;;  %2670 = vmatprep.subr.bf16.mxu1 %v3114_v4 }
  0x58   :  { %2694 = vmatprep.subr.bf16.mxu0 %v3114_v4 }
  0xc6   :  { %v70_v7 = vpop.xlane.xlu0 %69 }
  0xc7   :  { %v74_v8 = vmul.f32 0.0078125, %v70_v7 }
  0xc9   :  { %v3197_v9 = vsub.f32 %v67_v0, %v74_v8 }
  0xca   :  { %v72_v10 = vpop.xlane.xlu0 %71 }
  0xcb   :  { %v75_v11 = vmul.f32 0.0078125, %v72_v10  ;;  %v78_v12 = vmul.f32 %v3197_v9, %v3197_v9 }
  0xcd   :  { %v3201_v13 = vsub.f32 %v68_v1, %v75_v11  ;;  %80 = vadd.xlane.f32.xlu1 %v78_v12 }
  0xcf   :  { %v79_v14 = vmul.f32 %v3201_v13, %v3201_v13 }
  0xd1   :  { %82 = vadd.xlane.f32.xlu1 %v79_v14 }
 0x15a   :  { %v81_v36 = vpop.xlane.xlu1 %80 }
 0x15b   :  { %v84_v37 = vmul.f32 0.0078125, %v81_v36 }
 0x15d   :  { %v86_v38 = vadd.f32 1e-05, %v84_v37 }
 0x15e   :  { %v83_v39 = vpop.xlane.xlu1 %82 }
 0x15f   :  { %2941 = vrsqrt.f32 %v86_v38  ;;  %v85_v40 = vmul.f32 0.0078125, %v83_v39 }
 0x161   :  { %v87_v41 = vadd.f32 1e-05, %v85_v40 }
 0x163   :  { %2943 = vrsqrt.f32 %v87_v41 }
 0x169   :  { %v2942_v42 = vpop.eup %2941 }
 0x16a   :  { %v90_v43 = vmul.f32 %v2942_v42, %v3197_v9 }
 0x16c   :  { %v99_v47 = vmul.f32 %v2448_v44, %v90_v43 }
 0x16d   :  { %v2944_v45 = vpop.eup %2943 }
 0x16e   :  { %v91_v46 = vmul.f32 %v2944_v45, %v3201_v13  ;;  %v108_v50 = vadd.f32 %v2449_v48, %v99_v47 }
 0x170   :  { %v100_v49 = vmul.f32 %v2448_v44, %v91_v46 }
 0x172   :  { %v109_v51 = vadd.f32 %v2449_v48, %v100_v49 }
 0x174   :  { %v110_v52 = vpack.c.bf16 %v109_v51, %v108_v50 }
 0x176   :  { %308 = vmatmul.mubr.bf16.vlgmr.msra.gmra.mrb[0].mxu0 %v110_v52  ;;  %2667 = vmatmul.mubr.bf16.vlgmr.msra.gmra.mrb[0].mxu1 %v110_v52 }
 0x177   :  { %2672 = vmatprep.mubr.msk.bf16.mxu1 %vm3116_vm0, %v3114_v4  ;;  %2696 = vmatprep.mubr.msk.bf16.mxu0 %vm3116_vm0, %v3114_v4 }
 0x249   :  { %v309_v53 = vpop.f32.mrb[0].mxu0  ;;  %v352_v54 = vpop.f32.mrb[0].mxu1 }
 0x24a   :  { %v311_v55 = vpop.f32.mrb[1].mxu0  ;;  %v2668_v56 = vpop.f32.mrb[1].mxu1  ;;  %v3234_v0 = vpack.c.bf16 %v309_v53, %v309_v53  ;;  %v3243_v2 = vpack.c.bf16 %v352_v54, %v352_v54 }
 0x24b   :  { %v3227_v57 = vpack.c.bf16 %v311_v55, %v311_v55  ;;  %v313_v58 = vpop.f32.mrb[2].mxu0  ;;  %v355_v59 = vpop.f32.mrb[2].mxu1 }
 0x24c   :  { %v315_v60 = vpop.f32.mrb[3].mxu0  ;;  %v2669_v61 = vpop.f32.mrb[3].mxu1  ;;  %v3245_v3 = vpack.c.bf16 %v313_v58, %v313_v58  ;;  %v506_v5 = vsel %vm504_vm2, %v3243_v2, 0  ;;  %v3268_v32 = vpack.c.bf16 %v355_v59, %v355_v59 }
 0x24d   :  { %v388_v62 = vsel %vm383_vm1, %v3227_v57, 0  ;;  %v3232_v63 = vpack.c.bf16 %v315_v60, %v315_v60 }
 0x24e   :  { %2671 = vmatpush3.bf16.xpose.msra.mxu1 %v388_v62  ;;  %v552_v36 = vsel %vm504_vm2, %v3268_v32, 0 }
 0x24f   :  { %2676 = vmatprep.subr.bf16.mxu1 %v3114_v4  ;;  %v434_v1 = vsel %vm383_vm1, %v3232_v63, 0 }
 0x255   :  { %2673 = vmatmul.mubr.msk.bf16.vlgmr.msra.gmra.mrb[4].mxu1 %vm383_vm1, %v3234_v0 }
 0x256   :  { %2677 = vmatpush3.bf16.xpose.msra.mxu1 %v434_v1  ;;  %2678 = vmatprep.mubr.msk.bf16.mxu1 %vm3116_vm0, %v3114_v4 }
 0x257   :  { %2682 = vmatprep.subr.bf16.mxu1 %v3114_v4 }
 0x25d   :  { %2679 = vmatmul.mubr.msk.bf16.vlgmr.msra.gmra.mrb[8].mxu1 %vm383_vm1, %v3245_v3 }
 0x25e   :  { %2683 = vmatpush3.bf16.msra.mxu1 %v506_v5  ;;  %2684 = vmatprep.mubr.msk.bf16.mxu1 %vm3116_vm0, %v3114_v4 }
 0x25f   :  { %2688 = vmatprep.subr.bf16.mxu1 %v3114_v4 }
 0x328   :  { %v424_v6 = vpop.f32.mrb[4].mxu1 }
 0x329   :  { %v2674_v7 = vpop.f32.mrb[5].mxu1  ;;  %v477_v8 = vsel %vm476_vm3, %v424_v6, -inf }
 0x32a   :  { %478 = vmax.xlane.f32.xlu0 %v477_v8  ;;  %v427_v9 = vpop.f32.mrb[6].mxu1 }
 0x32b   :  { %v2675_v10 = vpop.f32.mrb[7].mxu1 }
 0x330   :  { %v470_v11 = vpop.f32.mrb[8].mxu1 }
 0x331   :  { %v2680_v12 = vpop.f32.mrb[9].mxu1  ;;  %v480_v13 = vsel %vm476_vm3, %v470_v11, -inf }
 0x332   :  { %481 = vmax.xlane.f32.xlu1 %v480_v13  ;;  %v473_v14 = vpop.f32.mrb[10].mxu1 }
 0x333   :  { %v2681_v15 = vpop.f32.mrb[11].mxu1 }
 0x343   :  { %664 = vrot.lane.b32.xlu1 %v3232_v63, %s3117_s3 }
 0x3b7   :  { %v479_v16 = vpop.xlane.xlu0 %478 }
 0x3b8   :  { %v483_v17 = vsub.f32 %v424_v6, %v479_v16 }
 0x3ba   :  { %v485_v18 = vmul.f32 1.442695, %v483_v17 }
 0x3bc   :  { %2945 = vpow2.f32 %v485_v18 }
 0x3bf   :  { %v482_v19 = vpop.xlane.xlu1 %481 }
 0x3c0   :  { %v484_v20 = vsub.f32 %v470_v11, %v482_v19 }
 0x3c2   :  { %v487_v21 = vmul.f32 1.442695, %v484_v20 }
 0x3c3   :  { %v665_v27 = vpop.permute.xlu1 %664 }
 0x3c4   :  { %2947 = vpow2.f32 %v487_v21  ;;  %v670_v40 = vsel %vm383_vm1, %v665_v27, 0 }
 0x3c6   :  { %v2946_v22 = vpop.eup %2945 }
 0x3c7   :  { %v489_v23 = vsel %vm476_vm3, %v2946_v22, 0.0 }
 0x3c8   :  { %490 = vadd.xlane.f32.xlu0 %v489_v23 }
 0x3ce   :  { %v2948_v24 = vpop.eup %2947 }
 0x3cf   :  { %v492_v25 = vsel %vm476_vm3, %v2948_v24, 0.0 }
 0x3d0   :  { %493 = vadd.xlane.f32.xlu1 %v492_v25 }
 0x3de   :  { %612 = vrot.lane.b32.xlu0 %v3227_v57, %s3117_s3 }
 0x3e1   :  { %609 = vrot.lane.b32.xlu1 %v3234_v0, %s3117_s3 }
 0x3e5   :  { %661 = vrot.lane.b32.xlu1 %v3245_v3, %s3117_s3 }
 0x455   :  { %v491_v26 = vpop.xlane.xlu0 %490 }
 0x456   :  { %2949 = vrcp.f32 %v491_v26 }
 0x459   :  { %v613_v28 = vpop.permute.xlu0 %612 }
 0x45a   :  { %v618_v29 = vsel %vm383_vm1, %v613_v28, 0 }
 0x45b   :  { %2695 = vmatpush3.bf16.xpose.msra.mxu0 %v618_v29 }
 0x45c   :  { %2706 = vmatprep.subr.bf16.mxu0 %v3114_v4 }
 0x45d   :  { %v494_v30 = vpop.xlane.xlu1 %493 }
 0x45e   :  { %2951 = vrcp.f32 %v494_v30 }
 0x460   :  { %v2950_v31 = vpop.eup %2949 }
 0x461   :  { %v497_v33 = vmul.f32 %v2950_v31, %v2946_v22  ;;  %v610_v34 = vpop.permute.xlu1 %609 }
 0x462   :  { %2697 = vmatmul.mubr.msk.bf16.vlgmr.msra.gmra.mrb[4].mxu0 %vm383_vm1, %v610_v34 }
 0x463   :  { %v499_v35 = vpack.c.bf16 %v497_v33, %v497_v33  ;;  %2708 = vmatprep.mubr.msk.bf16.mxu0 %vm3116_vm0, %v3114_v4 }
 0x465   :  { %2685 = vmatmul.mubr.msk.bf16.vlgmr.msra.gmra.mrb[12].mxu1 %vm476_vm3, %v499_v35  ;;  %v662_v41 = vpop.permute.xlu1 %661 }
 0x466   :  { %2689 = vmatpush3.bf16.msra.mxu1 %v552_v36  ;;  %2690 = vmatprep.mubr.msk.bf16.mxu1 %vm3116_vm0, %v3114_v4 }
 0x467   :  { %2700 = vmatprep.subr.bf16.mxu1 %v3114_v4 }
 0x468   :  { %v2952_v37 = vpop.eup %2951 }
 0x469   :  { %v498_v38 = vmul.f32 %v2952_v37, %v2948_v24 }
 0x46b   :  { %v500_v39 = vpack.c.bf16 %v498_v38, %v498_v38 }
 0x46d   :  { %2691 = vmatmul.mubr.msk.bf16.vlgmr.msra.gmra.mrb[16].mxu1 %vm476_vm3, %v500_v39 }
 0x46e   :  { %2702 = vmatprep.mubr.msk.bf16.mxu1 %vm3116_vm0, %v3114_v4 }
 0x46f   :  { %2701 = vmatpush3.bf16.xpose.msra.mxu1 %v670_v40 }
 0x470   :  { %2712 = vmatprep.subr.bf16.mxu1 %v3114_v4 }
 0x476   :  { %2703 = vmatmul.mubr.msk.bf16.vlgmr.msra.gmra.mrb[20].mxu1 %vm383_vm1, %v662_v41 }
 0x477   :  { %2714 = vmatprep.mubr.msk.bf16.mxu1 %vm3116_vm0, %v3114_v4 }
 0x535   :  { %v654_v42 = vpop.f32.mrb[4].mxu0 }
 0x536   :  { %v2698_v43 = vpop.f32.mrb[5].mxu0  ;;  %v712_v44 = vsel %vm476_vm3, %v654_v42, -inf }
 0x537   :  { %713 = vmax.xlane.f32.xlu0 %v712_v44  ;;  %v657_v45 = vpop.f32.mrb[6].mxu0 }
 0x538   :  { %v542_v46 = vpop.f32.mrb[12].mxu1  ;;  %v2699_v47 = vpop.f32.mrb[7].mxu0 }
 0x539   :  { %v2686_v48 = vpop.f32.mrb[13].mxu1 }
 0x53a   :  { %v545_v49 = vpop.f32.mrb[14].mxu1 }
 0x53b   :  { %v2687_v50 = vpop.f32.mrb[15].mxu1 }
 0x540   :  { %v588_v51 = vpop.f32.mrb[16].mxu1 }
 0x541   :  { %v594_v52 = vpack.c.bf16 %v588_v51, %v542_v46  ;;  %v2692_v53 = vpop.f32.mrb[17].mxu1 }
 0x542   :  { %v591_v54 = vpop.f32.mrb[18].mxu1 }
 0x543   :  { %595 = vst.msk [vmem:[#allocation5] sm:$0xff] %vm383_vm1, %v594_v52  ;;  %v2693_v55 = vpop.f32.mrb[19].mxu1 }
 0x549   :  { %v706_v56 = vpop.f32.mrb[20].mxu1 }
 0x54a   :  { %v2704_v58 = vpop.f32.mrb[21].mxu1  ;;  %v715_v59 = vsel %vm476_vm3, %v706_v56, -inf }
 0x54b   :  { %716 = vmax.xlane.f32.xlu1 %v715_v59  ;;  %v709_v60 = vpop.f32.mrb[22].mxu1 }
 0x54c   :  { %v2705_v61 = vpop.f32.mrb[23].mxu1 }
 0x55c   :  { %786 = vrot.lane.b32.xlu1 %v3268_v32, %s3117_s3 }
 0x560   :  { %857 = vrot.lane.b32.xlu1 %v3227_v57, %s3118_s4 }
 0x564   :  { %909 = vrot.lane.b32.xlu1 %v3232_v63, %s3118_s4 }
 0x568   :  { %906 = vrot.lane.b32.xlu1 %v3245_v3, %s3118_s4 }
 0x5c4   :  { %v714_v62 = vpop.xlane.xlu0 %713 }
 0x5c5   :  { %v718_v1 = vsub.f32 %v654_v42, %v714_v62 }
 0x5c7   :  { %v720_v5 = vmul.f32 1.442695, %v718_v1 }
 0x5c9   :  { %2953 = vpow2.f32 %v720_v5 }
 0x5d3   :  { %v2954_v6 = vpop.eup %2953 }
 0x5d4   :  { %v724_v7 = vsel %vm476_vm3, %v2954_v6, 0.0 }
 0x5d5   :  { %725 = vadd.xlane.f32.xlu0 %v724_v7 }
 0x5d8   :  { %v717_v8 = vpop.xlane.xlu1 %716 }
 0x5d9   :  { %v719_v9 = vsub.f32 %v706_v56, %v717_v8 }
 0x5db   :  { %v722_v10 = vmul.f32 1.442695, %v719_v9 }
 0x5dc   :  { %v787_v11 = vpop.permute.xlu1 %786 }
 0x5dd   :  { %2955 = vpow2.f32 %v722_v10  ;;  %v792_v12 = vsel %vm504_vm2, %v787_v11, 0 }
 0x5de   :  { %2713 = vmatpush3.bf16.msra.mxu1 %v792_v12 }
 0x5df   :  { %2724 = vmatprep.subr.bf16.mxu1 %v3114_v4 }
 0x5e0   :  { %v858_v21 = vpop.permute.xlu1 %857 }
 0x5e1   :  { %v863_v26 = vsel %vm383_vm1, %v858_v21, 0 }
 0x5e4   :  { %v910_v25 = vpop.permute.xlu1 %909 }
 0x5e5   :  { %v915_v28 = vsel %vm383_vm1, %v910_v25, 0 }
 0x5e7   :  { %v2956_v13 = vpop.eup %2955 }
 0x5e8   :  { %v727_v14 = vsel %vm476_vm3, %v2956_v13, 0.0  ;;  %v907_v30 = vpop.permute.xlu1 %906 }
 0x5e9   :  { %728 = vadd.xlane.f32.xlu0 %v727_v14 }
 0x5ff   :  { %737 = vrot.lane.b32.xlu0 %v3243_v2, %s3117_s3 }
 0x603   :  { %854 = vrot.lane.b32.xlu0 %v3234_v0, %s3118_s4 }
 0x662   :  { %v726_v15 = vpop.xlane.xlu0 %725 }
 0x663   :  { %2957 = vrcp.f32 %v726_v15 }
 0x66d   :  { %v2958_v16 = vpop.eup %2957 }
 0x66e   :  { %v732_v18 = vmul.f32 %v2958_v16, %v2954_v6 }
 0x670   :  { %v734_v22 = vpack.c.bf16 %v732_v18, %v732_v18 }
 0x676   :  { %v729_v17 = vpop.xlane.xlu0 %728 }
 0x677   :  { %2959 = vrcp.f32 %v729_v17 }
 0x67a   :  { %v738_v19 = vpop.permute.xlu0 %737 }
 0x67b   :  { %v743_v20 = vsel %vm504_vm2, %v738_v19, 0 }
 0x67c   :  { %2707 = vmatpush3.bf16.msra.mxu0 %v743_v20 }
 0x67d   :  { %2718 = vmatprep.subr.bf16.mxu0 %v3114_v4 }
 0x67e   :  { %v855_v29 = vpop.permute.xlu0 %854 }
 0x67f   :  { %2709 = vmatmul.mubr.msk.bf16.vlgmr.msra.gmra.mrb[8].mxu0 %vm476_vm3, %v734_v22 }
 0x680   :  { %2720 = vmatprep.mubr.msk.bf16.mxu0 %vm3116_vm0, %v3114_v4 }
 0x681   :  { %v2960_v23 = vpop.eup %2959 }
 0x682   :  { %v733_v24 = vmul.f32 %v2960_v23, %v2956_v13 }
 0x684   :  { %v735_v27 = vpack.c.bf16 %v733_v24, %v733_v24 }
 0x685   :  { %2719 = vmatpush3.bf16.xpose.msra.mxu0 %v863_v26 }
 0x686   :  { %2715 = vmatmul.mubr.msk.bf16.vlgmr.msra.gmra.mrb[24].mxu1 %vm476_vm3, %v735_v27  ;;  %2730 = vmatprep.subr.bf16.mxu0 %v3114_v4 }
 0x687   :  { %2725 = vmatpush3.bf16.xpose.msra.mxu1 %v915_v28  ;;  %2726 = vmatprep.mubr.msk.bf16.mxu1 %vm3116_vm0, %v3114_v4 }
 0x688   :  { %2736 = vmatprep.subr.bf16.mxu1 %v3114_v4 }
 0x68c   :  { %2721 = vmatmul.mubr.msk.bf16.vlgmr.msra.gmra.mrb[12].mxu0 %vm383_vm1, %v855_v29 }
 0x68d   :  { %2732 = vmatprep.mubr.msk.bf16.mxu0 %vm3116_vm0, %v3114_v4 }
 0x68e   :  { %2727 = vmatmul.mubr.msk.bf16.vlgmr.msra.gmra.mrb[28].mxu1 %vm383_vm1, %v907_v30 }
 0x68f   :  { %2738 = vmatprep.mubr.msk.bf16.mxu1 %vm3116_vm0, %v3114_v4 }
 0x752   :  { %v3324_v31 = vpop.f32.mrb[8].mxu0 }
 0x753   :  { %v2710_v33 = vpop.f32.mrb[9].mxu0 }
 0x754   :  { %v782_v34 = vpop.f32.mrb[10].mxu0 }
 0x755   :  { %v2711_v35 = vpop.f32.mrb[11].mxu0 }
 0x759   :  { %v3326_v36 = vpop.f32.mrb[24].mxu1 }
 0x75a   :  { %v834_v37 = vpack.c.bf16 %v3326_v36, %v3324_v31  ;;  %v2716_v38 = vpop.f32.mrb[25].mxu1 }
 0x75b   :  { %v831_v39 = vpop.f32.mrb[26].mxu1 }
 0x75c   :  { %v2717_v40 = vpop.f32.mrb[27].mxu1 }
 0x75f   :  { %v899_v41 = vpop.f32.mrb[12].mxu0 }
 0x760   :  { %v2722_v42 = vpop.f32.mrb[13].mxu0  ;;  %v957_v43 = vsel %vm476_vm3, %v899_v41, -inf }
 0x761   :  { %958 = vmax.xlane.f32.xlu0 %v957_v43  ;;  %v902_v44 = vpop.f32.mrb[14].mxu0  ;;  %v951_v45 = vpop.f32.mrb[28].mxu1 }
 0x762   :  { %v2723_v46 = vpop.f32.mrb[15].mxu0  ;;  %v2728_v47 = vpop.f32.mrb[29].mxu1  ;;  %v960_v48 = vsel %vm476_vm3, %v951_v45, -inf }
 0x763   :  { %961 = vmax.xlane.f32.xlu1 %v960_v48  ;;  %v954_v49 = vpop.f32.mrb[30].mxu1 }
 0x764   :  { %v2729_v50 = vpop.f32.mrb[31].mxu1 }
 0x774   :  { %1031 = vrot.lane.b32.xlu1 %v3268_v32, %s3118_s4 }
 0x778   :  { %1102 = vrot.lane.b32.xlu1 %v3227_v57, %s3119_s11 }
 0x77c   :  { %1154 = vrot.lane.b32.xlu1 %v3232_v63, %s3119_s11 }
 0x780   :  { %1151 = vrot.lane.b32.xlu1 %v3245_v3, %s3119_s11 }
 0x7ee   :  { %v959_v51 = vpop.xlane.xlu0 %958 }
 0x7ef   :  { %v963_v52 = vsub.f32 %v899_v41, %v959_v51 }
 0x7f0   :  { %v962_v53 = vpop.xlane.xlu1 %961 }
 0x7f1   :  { %v965_v54 = vmul.f32 1.442695, %v963_v52  ;;  %v964_v55 = vsub.f32 %v951_v45, %v962_v53 }
 0x7f3   :  { %2961 = vpow2.f32 %v965_v54  ;;  %v967_v56 = vmul.f32 1.442695, %v964_v55 }
 0x7f4   :  { %v1032_v58 = vpop.permute.xlu1 %1031 }
 0x7f5   :  { %2963 = vpow2.f32 %v967_v56  ;;  %v1037_v59 = vsel %vm504_vm2, %v1032_v58, 0 }
 0x7f6   :  { %2737 = vmatpush3.bf16.msra.mxu1 %v1037_v59 }
 0x7f7   :  { %2748 = vmatprep.subr.bf16.mxu1 %v3114_v4 }
 0x7f8   :  { %v1103_v10 = vpop.permute.xlu1 %1102 }
 0x7f9   :  { %v1108_v16 = vsel %vm383_vm1, %v1103_v10, 0 }
 0x7fc   :  { %v1155_v15 = vpop.permute.xlu1 %1154 }
 0x7fd   :  { %v2962_v60 = vpop.eup %2961  ;;  %v1160_v18 = vsel %vm383_vm1, %v1155_v15, 0 }
 0x7fe   :  { %v969_v61 = vsel %vm476_vm3, %v2962_v60, 0.0 }
 0x7ff   :  { %v2964_v62 = vpop.eup %2963  ;;  %970 = vadd.xlane.f32.xlu0 %v969_v61 }
 0x800   :  { %v972_v1 = vsel %vm476_vm3, %v2964_v62, 0.0  ;;  %v1152_v20 = vpop.permute.xlu1 %1151 }
 0x803   :  { %973 = vadd.xlane.f32.xlu0 %v972_v1 }
 0x819   :  { %982 = vrot.lane.b32.xlu0 %v3243_v2, %s3118_s4 }
 0x81d   :  { %1099 = vrot.lane.b32.xlu0 %v3234_v0, %s3119_s11 }
 0x88c   :  { %v971_v5 = vpop.xlane.xlu0 %970 }
 0x88d   :  { %2965 = vrcp.f32 %v971_v5 }
 0x890   :  { %v974_v6 = vpop.xlane.xlu0 %973 }
 0x891   :  { %2967 = vrcp.f32 %v974_v6 }
 0x894   :  { %v983_v7 = vpop.permute.xlu0 %982 }
 0x895   :  { %v988_v8 = vsel %vm504_vm2, %v983_v7, 0 }
 0x896   :  { %2731 = vmatpush3.bf16.msra.mxu0 %v988_v8 }
 0x897   :  { %v2966_v9 = vpop.eup %2965  ;;  %2742 = vmatprep.subr.bf16.mxu0 %v3114_v4 }
 0x898   :  { %v977_v11 = vmul.f32 %v2966_v9, %v2962_v60  ;;  %v1100_v19 = vpop.permute.xlu0 %1099 }
 0x89a   :  { %v979_v12 = vpack.c.bf16 %v977_v11, %v977_v11 }
 0x89b   :  { %v2968_v13 = vpop.eup %2967 }
 0x89c   :  { %v978_v14 = vmul.f32 %v2968_v13, %v2964_v62  ;;  %2733 = vmatmul.mubr.msk.bf16.vlgmr.msra.gmra.mrb[16].mxu0 %vm476_vm3, %v979_v12 }
 0x89d   :  { %2744 = vmatprep.mubr.msk.bf16.mxu0 %vm3116_vm0, %v3114_v4 }
 0x89e   :  { %v980_v17 = vpack.c.bf16 %v978_v14, %v978_v14 }
 0x89f   :  { %2743 = vmatpush3.bf16.xpose.msra.mxu0 %v1108_v16 }
 0x8a0   :  { %2739 = vmatmul.mubr.msk.bf16.vlgmr.msra.gmra.mrb[32].mxu1 %vm476_vm3, %v980_v17  ;;  %2754 = vmatprep.subr.bf16.mxu0 %v3114_v4 }
 0x8a1   :  { %2749 = vmatpush3.bf16.xpose.msra.mxu1 %v1160_v18  ;;  %2750 = vmatprep.mubr.msk.bf16.mxu1 %vm3116_vm0, %v3114_v4 }
 0x8a2   :  { %2760 = vmatprep.subr.bf16.mxu1 %v3114_v4 }
 0x8a6   :  { %2745 = vmatmul.mubr.msk.bf16.vlgmr.msra.gmra.mrb[20].mxu0 %vm383_vm1, %v1100_v19 }
 0x8a7   :  { %2756 = vmatprep.mubr.msk.bf16.mxu0 %vm3116_vm0, %v3114_v4 }
 0x8a8   :  { %2751 = vmatmul.mubr.msk.bf16.vlgmr.msra.gmra.mrb[36].mxu1 %vm383_vm1, %v1152_v20 }
 0x8a9   :  { %2762 = vmatprep.mubr.msk.bf16.mxu1 %vm3116_vm0, %v3114_v4 }
 0x96f   :  { %v3366_v21 = vpop.f32.mrb[16].mxu0 }
 0x970   :  { %v2734_v22 = vpop.f32.mrb[17].mxu0 }
 0x971   :  { %v1027_v23 = vpop.f32.mrb[18].mxu0 }
 0x972   :  { %v2735_v24 = vpop.f32.mrb[19].mxu0 }
 0x973   :  { %v3368_v25 = vpop.f32.mrb[32].mxu1 }
 0x974   :  { %v1079_v26 = vpack.c.bf16 %v3368_v25, %v3366_v21  ;;  %v2740_v27 = vpop.f32.mrb[33].mxu1 }
 0x975   :  { %v1076_v28 = vpop.f32.mrb[34].mxu1 }
 0x976   :  { %v2741_v29 = vpop.f32.mrb[35].mxu1 }
 0x979   :  { %v1144_v30 = vpop.f32.mrb[20].mxu0 }
 0x97a   :  { %v2746_v33 = vpop.f32.mrb[21].mxu0  ;;  %v1202_v34 = vsel %vm476_vm3, %v1144_v30, -inf }
 0x97b   :  { %1203 = vmax.xlane.f32.xlu0 %v1202_v34  ;;  %v1147_v35 = vpop.f32.mrb[22].mxu0  ;;  %v1196_v38 = vpop.f32.mrb[36].mxu1 }
 0x97c   :  { %v2747_v39 = vpop.f32.mrb[23].mxu0  ;;  %v2752_v40 = vpop.f32.mrb[37].mxu1  ;;  %v1205_v41 = vsel %vm476_vm3, %v1196_v38, -inf }
 0x97d   :  { %1206 = vmax.xlane.f32.xlu1 %v1205_v41  ;;  %v1199_v42 = vpop.f32.mrb[38].mxu1 }
 0x97e   :  { %v2753_v43 = vpop.f32.mrb[39].mxu1 }
 0x98e   :  { %1276 = vrot.lane.b32.xlu1 %v3268_v32, %s3119_s11 }
 0x992   :  { %1347 = vrot.lane.b32.xlu1 %v3227_v57, %s3112_s0 }
 0x996   :  { %1399 = vrot.lane.b32.xlu1 %v3232_v63, %s3112_s0 }
 0x99a   :  { %1396 = vrot.lane.b32.xlu1 %v3245_v3, %s3112_s0 }
 0xa08   :  { %v1204_v44 = vpop.xlane.xlu0 %1203 }
 0xa09   :  { %v1208_v45 = vsub.f32 %v1144_v30, %v1204_v44 }
 0xa0a   :  { %v1207_v46 = vpop.xlane.xlu1 %1206 }
 0xa0b   :  { %v1210_v47 = vmul.f32 1.442695, %v1208_v45  ;;  %v1209_v48 = vsub.f32 %v1196_v38, %v1207_v46 }
 0xa0d   :  { %2969 = vpow2.f32 %v1210_v47  ;;  %v1212_v49 = vmul.f32 1.442695, %v1209_v48 }
 0xa0e   :  { %v1277_v50 = vpop.permute.xlu1 %1276 }
 0xa0f   :  { %2971 = vpow2.f32 %v1212_v49  ;;  %v1282_v51 = vsel %vm504_vm2, %v1277_v50, 0 }
 0xa10   :  { %2761 = vmatpush3.bf16.msra.mxu1 %v1282_v51 }
 0xa11   :  { %2772 = vmatprep.subr.bf16.mxu1 %v3114_v4 }
 0xa12   :  { %v1348_v62 = vpop.permute.xlu1 %1347 }
 0xa13   :  { %v1353_v9 = vsel %vm383_vm1, %v1348_v62, 0 }
 0xa16   :  { %v1400_v8 = vpop.permute.xlu1 %1399 }
 0xa17   :  { %v2970_v52 = vpop.eup %2969  ;;  %v1405_v11 = vsel %vm383_vm1, %v1400_v8, 0 }
 0xa18   :  { %v1214_v53 = vsel %vm476_vm3, %v2970_v52, 0.0 }
 0xa19   :  { %v2972_v54 = vpop.eup %2971  ;;  %1215 = vadd.xlane.f32.xlu0 %v1214_v53 }
 0xa1a   :  { %v1217_v55 = vsel %vm476_vm3, %v2972_v54, 0.0  ;;  %v1397_v13 = vpop.permute.xlu1 %1396 }
 0xa1d   :  { %1218 = vadd.xlane.f32.xlu0 %v1217_v55 }
 0xa33   :  { %1227 = vrot.lane.b32.xlu0 %v3243_v2, %s3119_s11 }
 0xa37   :  { %1344 = vrot.lane.b32.xlu0 %v3234_v0, %s3112_s0 }
 0xaa6   :  { %v1216_v56 = vpop.xlane.xlu0 %1215 }
 0xaa7   :  { %2973 = vrcp.f32 %v1216_v56 }
 0xaaa   :  { %v1219_v58 = vpop.xlane.xlu0 %1218 }
 0xaab   :  { %2975 = vrcp.f32 %v1219_v58 }
 0xaae   :  { %v1228_v59 = vpop.permute.xlu0 %1227 }
 0xaaf   :  { %v1233_v60 = vsel %vm504_vm2, %v1228_v59, 0 }
 0xab0   :  { %2755 = vmatpush3.bf16.msra.mxu0 %v1233_v60 }
 0xab1   :  { %v2974_v61 = vpop.eup %2973  ;;  %2766 = vmatprep.subr.bf16.mxu0 %v3114_v4 }
 0xab2   :  { %v1222_v1 = vmul.f32 %v2974_v61, %v2970_v52  ;;  %v1345_v12 = vpop.permute.xlu0 %1344 }
 0xab4   :  { %v1224_v5 = vpack.c.bf16 %v1222_v1, %v1222_v1 }
 0xab5   :  { %v2976_v6 = vpop.eup %2975 }
 0xab6   :  { %v1223_v7 = vmul.f32 %v2976_v6, %v2972_v54  ;;  %2757 = vmatmul.mubr.msk.bf16.vlgmr.msra.gmra.mrb[24].mxu0 %vm476_vm3, %v1224_v5 }
 0xab7   :  { %2768 = vmatprep.mubr.msk.bf16.mxu0 %vm3116_vm0, %v3114_v4 }
 0xab8   :  { %v1225_v10 = vpack.c.bf16 %v1223_v7, %v1223_v7 }
 0xab9   :  { %2767 = vmatpush3.bf16.xpose.msra.mxu0 %v1353_v9 }
 0xaba   :  { %2763 = vmatmul.mubr.msk.bf16.vlgmr.msra.gmra.mrb[40].mxu1 %vm476_vm3, %v1225_v10  ;;  %2778 = vmatprep.subr.bf16.mxu0 %v3114_v4 }
 0xabb   :  { %2773 = vmatpush3.bf16.xpose.msra.mxu1 %v1405_v11  ;;  %2774 = vmatprep.mubr.msk.bf16.mxu1 %vm3116_vm0, %v3114_v4 }
 0xabc   :  { %2784 = vmatprep.subr.bf16.mxu1 %v3114_v4 }
 0xac0   :  { %2769 = vmatmul.mubr.msk.bf16.vlgmr.msra.gmra.mrb[28].mxu0 %vm383_vm1, %v1345_v12 }
 0xac1   :  { %2780 = vmatprep.mubr.msk.bf16.mxu0 %vm3116_vm0, %v3114_v4 }
 0xac2   :  { %2775 = vmatmul.mubr.msk.bf16.vlgmr.msra.gmra.mrb[44].mxu1 %vm383_vm1, %v1397_v13 }
 0xac3   :  { %2786 = vmatprep.mubr.msk.bf16.mxu1 %vm3116_vm0, %v3114_v4 }
 0xb89   :  { %v3408_v14 = vpop.f32.mrb[24].mxu0 }
 0xb8a   :  { %v2758_v15 = vpop.f32.mrb[25].mxu0 }
 0xb8b   :  { %v1272_v16 = vpop.f32.mrb[26].mxu0 }
 0xb8c   :  { %v2759_v17 = vpop.f32.mrb[27].mxu0 }
 0xb8d   :  { %v3410_v18 = vpop.f32.mrb[40].mxu1 }
 0xb8e   :  { %v1324_v19 = vpack.c.bf16 %v3410_v18, %v3408_v14  ;;  %v2764_v20 = vpop.f32.mrb[41].mxu1 }
 0xb8f   :  { %v1321_v22 = vpop.f32.mrb[42].mxu1 }
 0xb90   :  { %v2765_v23 = vpop.f32.mrb[43].mxu1 }
 0xb93   :  { %v1389_v24 = vpop.f32.mrb[28].mxu0 }
 0xb94   :  { %v2770_v27 = vpop.f32.mrb[29].mxu0  ;;  %v1447_v28 = vsel %vm476_vm3, %v1389_v24, -inf }
 0xb95   :  { %1448 = vmax.xlane.f32.xlu0 %v1447_v28  ;;  %v1392_v29 = vpop.f32.mrb[30].mxu0  ;;  %v1441_v30 = vpop.f32.mrb[44].mxu1 }
 0xb96   :  { %v2771_v33 = vpop.f32.mrb[31].mxu0  ;;  %v2776_v34 = vpop.f32.mrb[45].mxu1  ;;  %v1450_v35 = vsel %vm476_vm3, %v1441_v30, -inf }
 0xb97   :  { %1451 = vmax.xlane.f32.xlu1 %v1450_v35  ;;  %v1444_v38 = vpop.f32.mrb[46].mxu1 }
 0xb98   :  { %v2777_v39 = vpop.f32.mrb[47].mxu1 }
 0xba8   :  { %1521 = vrot.lane.b32.xlu1 %v3268_v32, %s3112_s0 }
 0xbac   :  { %1592 = vrot.lane.b32.xlu1 %v3227_v57, %s3120_s12 }
 0xbb0   :  { %1644 = vrot.lane.b32.xlu1 %v3232_v63, %s3120_s12 }
 0xbb4   :  { %1641 = vrot.lane.b32.xlu1 %v3245_v3, %s3120_s12 }
 0xc22   :  { %v1449_v40 = vpop.xlane.xlu0 %1448 }
 0xc23   :  { %v1453_v41 = vsub.f32 %v1389_v24, %v1449_v40 }
 0xc24   :  { %v1452_v42 = vpop.xlane.xlu1 %1451 }
 0xc25   :  { %v1455_v43 = vmul.f32 1.442695, %v1453_v41  ;;  %v1454_v44 = vsub.f32 %v1441_v30, %v1452_v42 }
 0xc27   :  { %2977 = vpow2.f32 %v1455_v43  ;;  %v1457_v45 = vmul.f32 1.442695, %v1454_v44 }
 0xc28   :  { %v1522_v46 = vpop.permute.xlu1 %1521 }
 0xc29   :  { %2979 = vpow2.f32 %v1457_v45  ;;  %v1527_v47 = vsel %vm504_vm2, %v1522_v46, 0 }
 0xc2a   :  { %2785 = vmatpush3.bf16.msra.mxu1 %v1527_v47 }
 0xc2b   :  { %2796 = vmatprep.subr.bf16.mxu1 %v3114_v4 }
 0xc2c   :  { %v1593_v58 = vpop.permute.xlu1 %1592 }
 0xc2d   :  { %v1598_v5 = vsel %vm383_vm1, %v1593_v58, 0 }
 0xc30   :  { %v1645_v1 = vpop.permute.xlu1 %1644 }
 0xc31   :  { %v2978_v48 = vpop.eup %2977  ;;  %v1650_v7 = vsel %vm383_vm1, %v1645_v1, 0 }
 0xc32   :  { %v1459_v49 = vsel %vm476_vm3, %v2978_v48, 0.0 }
 0xc33   :  { %v2980_v50 = vpop.eup %2979  ;;  %1460 = vadd.xlane.f32.xlu0 %v1459_v49 }
 0xc34   :  { %v1462_v51 = vsel %vm476_vm3, %v2980_v50, 0.0  ;;  %v1642_v9 = vpop.permute.xlu1 %1641 }
 0xc37   :  { %1463 = vadd.xlane.f32.xlu0 %v1462_v51 }
 0xc4d   :  { %1472 = vrot.lane.b32.xlu0 %v3243_v2, %s3112_s0 }
 0xc51   :  { %1589 = vrot.lane.b32.xlu0 %v3234_v0, %s3120_s12 }
 0xcc0   :  { %v1461_v52 = vpop.xlane.xlu0 %1460 }
 0xcc1   :  { %2981 = vrcp.f32 %v1461_v52 }
 0xcc4   :  { %v1464_v53 = vpop.xlane.xlu0 %1463 }
 0xcc5   :  { %2983 = vrcp.f32 %v1464_v53 }
 0xcc8   :  { %v1473_v54 = vpop.permute.xlu0 %1472 }
 0xcc9   :  { %v1478_v55 = vsel %vm504_vm2, %v1473_v54, 0 }
 0xcca   :  { %2779 = vmatpush3.bf16.msra.mxu0 %v1478_v55 }
 0xccb   :  { %v2982_v56 = vpop.eup %2981  ;;  %2790 = vmatprep.subr.bf16.mxu0 %v3114_v4 }
 0xccc   :  { %v1467_v59 = vmul.f32 %v2982_v56, %v2978_v48  ;;  %v1590_v8 = vpop.permute.xlu0 %1589 }
 0xcce   :  { %v1469_v60 = vpack.c.bf16 %v1467_v59, %v1467_v59 }
 0xccf   :  { %v2984_v61 = vpop.eup %2983 }
 0xcd0   :  { %v1468_v62 = vmul.f32 %v2984_v61, %v2980_v50  ;;  %2781 = vmatmul.mubr.msk.bf16.vlgmr.msra.gmra.mrb[32].mxu0 %vm476_vm3, %v1469_v60 }
 0xcd1   :  { %2792 = vmatprep.mubr.msk.bf16.mxu0 %vm3116_vm0, %v3114_v4 }
 0xcd2   :  { %v1470_v6 = vpack.c.bf16 %v1468_v62, %v1468_v62 }
 0xcd3   :  { %2791 = vmatpush3.bf16.xpose.msra.mxu0 %v1598_v5 }
 0xcd4   :  { %2787 = vmatmul.mubr.msk.bf16.vlgmr.msra.gmra.mrb[48].mxu1 %vm476_vm3, %v1470_v6  ;;  %2802 = vmatprep.subr.bf16.mxu0 %v3114_v4 }
 0xcd5   :  { %2797 = vmatpush3.bf16.xpose.msra.mxu1 %v1650_v7  ;;  %2798 = vmatprep.mubr.msk.bf16.mxu1 %vm3116_vm0, %v3114_v4 }
 0xcd6   :  { %2808 = vmatprep.subr.bf16.mxu1 %v3114_v4 }
 0xcda   :  { %2793 = vmatmul.mubr.msk.bf16.vlgmr.msra.gmra.mrb[36].mxu0 %vm383_vm1, %v1590_v8 }
 0xcdb   :  { %2804 = vmatprep.mubr.msk.bf16.mxu0 %vm3116_vm0, %v3114_v4 }
 0xcdc   :  { %2799 = vmatmul.mubr.msk.bf16.vlgmr.msra.gmra.mrb[52].mxu1 %vm383_vm1, %v1642_v9 }
 0xcdd   :  { %2810 = vmatprep.mubr.msk.bf16.mxu1 %vm3116_vm0, %v3114_v4 }
 0xda3   :  { %v3450_v10 = vpop.f32.mrb[32].mxu0 }
 0xda4   :  { %v2782_v11 = vpop.f32.mrb[33].mxu0 }
 0xda5   :  { %v1517_v12 = vpop.f32.mrb[34].mxu0 }
 0xda6   :  { %v2783_v13 = vpop.f32.mrb[35].mxu0 }
 0xda7   :  { %v3452_v15 = vpop.f32.mrb[48].mxu1 }
 0xda8   :  { %v1569_v16 = vpack.c.bf16 %v3452_v15, %v3450_v10  ;;  %v2788_v17 = vpop.f32.mrb[49].mxu1 }
 0xda9   :  { %v1566_v20 = vpop.f32.mrb[50].mxu1 }
 0xdaa   :  { %v2789_v22 = vpop.f32.mrb[51].mxu1 }
 0xdad   :  { %v1634_v23 = vpop.f32.mrb[36].mxu0 }
 0xdae   :  { %v2794_v24 = vpop.f32.mrb[37].mxu0  ;;  %v1692_v27 = vsel %vm476_vm3, %v1634_v23, -inf }
 0xdaf   :  { %1693 = vmax.xlane.f32.xlu0 %v1692_v27  ;;  %v1637_v28 = vpop.f32.mrb[38].mxu0  ;;  %v1686_v29 = vpop.f32.mrb[52].mxu1 }
 0xdb0   :  { %v2795_v30 = vpop.f32.mrb[39].mxu0  ;;  %v2800_v33 = vpop.f32.mrb[53].mxu1  ;;  %v1695_v34 = vsel %vm476_vm3, %v1686_v29, -inf }
 0xdb1   :  { %1696 = vmax.xlane.f32.xlu1 %v1695_v34  ;;  %v1689_v35 = vpop.f32.mrb[54].mxu1 }
 0xdb2   :  { %v2801_v38 = vpop.f32.mrb[55].mxu1 }
 0xdc2   :  { %1766 = vrot.lane.b32.xlu1 %v3268_v32, %s3120_s12 }
 0xdc6   :  { %1837 = vrot.lane.b32.xlu1 %v3227_v57, %s3121_s13 }
 0xdca   :  { %1889 = vrot.lane.b32.xlu1 %v3232_v63, %s3121_s13 }
 0xdce   :  { %1886 = vrot.lane.b32.xlu1 %v3245_v3, %s3121_s13 }
 0xe3c   :  { %v1694_v39 = vpop.xlane.xlu0 %1693 }
 0xe3d   :  { %v1698_v40 = vsub.f32 %v1634_v23, %v1694_v39 }
 0xe3e   :  { %v1697_v41 = vpop.xlane.xlu1 %1696 }
 0xe3f   :  { %v1700_v42 = vmul.f32 1.442695, %v1698_v40  ;;  %v1699_v43 = vsub.f32 %v1686_v29, %v1697_v41 }
 0xe41   :  { %2985 = vpow2.f32 %v1700_v42  ;;  %v1702_v44 = vmul.f32 1.442695, %v1699_v43 }
 0xe42   :  { %v1767_v45 = vpop.permute.xlu1 %1766 }
 0xe43   :  { %2987 = vpow2.f32 %v1702_v44  ;;  %v1772_v46 = vsel %vm504_vm2, %v1767_v45, 0 }
 0xe44   :  { %2809 = vmatpush3.bf16.msra.mxu1 %v1772_v46 }
 0xe45   :  { %2820 = vmatprep.subr.bf16.mxu1 %v3114_v4 }
 0xe46   :  { %v1838_v56 = vpop.permute.xlu1 %1837 }
 0xe47   :  { %v1843_v1 = vsel %vm383_vm1, %v1838_v56, 0 }
 0xe4a   :  { %v1890_v62 = vpop.permute.xlu1 %1889 }
 0xe4b   :  { %v2986_v47 = vpop.eup %2985  ;;  %v1895_v6 = vsel %vm383_vm1, %v1890_v62, 0 }
 0xe4c   :  { %v1704_v48 = vsel %vm476_vm3, %v2986_v47, 0.0 }
 0xe4d   :  { %v2988_v49 = vpop.eup %2987  ;;  %1705 = vadd.xlane.f32.xlu0 %v1704_v48 }
 0xe4e   :  { %v1707_v50 = vsel %vm476_vm3, %v2988_v49, 0.0  ;;  %v1887_v8 = vpop.permute.xlu1 %1886 }
 0xe51   :  { %1708 = vadd.xlane.f32.xlu0 %v1707_v50 }
 0xe67   :  { %1717 = vrot.lane.b32.xlu0 %v3243_v2, %s3120_s12 }
 0xe6b   :  { %1834 = vrot.lane.b32.xlu0 %v3234_v0, %s3121_s13 }
 0xeda   :  { %v1706_v51 = vpop.xlane.xlu0 %1705 }
 0xedb   :  { %2989 = vrcp.f32 %v1706_v51 }
 0xede   :  { %v1709_v52 = vpop.xlane.xlu0 %1708 }
 0xedf   :  { %2991 = vrcp.f32 %v1709_v52 }
 0xee2   :  { %v1718_v53 = vpop.permute.xlu0 %1717 }
 0xee3   :  { %v1723_v54 = vsel %vm504_vm2, %v1718_v53, 0 }
 0xee4   :  { %2803 = vmatpush3.bf16.msra.mxu0 %v1723_v54 }
 0xee5   :  { %v2990_v55 = vpop.eup %2989  ;;  %2814 = vmatprep.subr.bf16.mxu0 %v3114_v4 }
 0xee6   :  { %v1712_v58 = vmul.f32 %v2990_v55, %v2986_v47  ;;  %v1835_v7 = vpop.permute.xlu0 %1834 }
 0xee8   :  { %v1714_v59 = vpack.c.bf16 %v1712_v58, %v1712_v58 }
 0xee9   :  { %v2992_v60 = vpop.eup %2991 }
 0xeea   :  { %v1713_v61 = vmul.f32 %v2992_v60, %v2988_v49  ;;  %2805 = vmatmul.mubr.msk.bf16.vlgmr.msra.gmra.mrb[40].mxu0 %vm476_vm3, %v1714_v59 }
 0xeeb   :  { %2816 = vmatprep.mubr.msk.bf16.mxu0 %vm3116_vm0, %v3114_v4 }
 0xeec   :  { %v1715_v5 = vpack.c.bf16 %v1713_v61, %v1713_v61 }
 0xeed   :  { %2815 = vmatpush3.bf16.xpose.msra.mxu0 %v1843_v1 }
 0xeee   :  { %2811 = vmatmul.mubr.msk.bf16.vlgmr.msra.gmra.mrb[56].mxu1 %vm476_vm3, %v1715_v5  ;;  %2826 = vmatprep.subr.bf16.mxu0 %v3114_v4 }
 0xeef   :  { %2821 = vmatpush3.bf16.xpose.msra.mxu1 %v1895_v6  ;;  %2822 = vmatprep.mubr.msk.bf16.mxu1 %vm3116_vm0, %v3114_v4 }
 0xef0   :  { %2832 = vmatprep.subr.bf16.mxu1 %v3114_v4 }
 0xef4   :  { %2817 = vmatmul.mubr.msk.bf16.vlgmr.msra.gmra.mrb[44].mxu0 %vm383_vm1, %v1835_v7 }
 0xef5   :  { %2828 = vmatprep.mubr.msk.bf16.mxu0 %vm3116_vm0, %v3114_v4 }
 0xef6   :  { %2823 = vmatmul.mubr.msk.bf16.vlgmr.msra.gmra.mrb[60].mxu1 %vm383_vm1, %v1887_v8 }
 0xef7   :  { %2834 = vmatprep.mubr.msk.bf16.mxu1 %vm3116_vm0, %v3114_v4 }
 0xfbd   :  { %v3492_v9 = vpop.f32.mrb[40].mxu0 }
 0xfbe   :  { %v2806_v11 = vpop.f32.mrb[41].mxu0 }
 0xfbf   :  { %v1762_v12 = vpop.f32.mrb[42].mxu0 }
 0xfc0   :  { %v2807_v13 = vpop.f32.mrb[43].mxu0 }
 0xfc1   :  { %v3494_v17 = vpop.f32.mrb[56].mxu1 }
 0xfc2   :  { %v1814_v20 = vpack.c.bf16 %v3494_v17, %v3492_v9  ;;  %v2812_v22 = vpop.f32.mrb[57].mxu1 }
 0xfc3   :  { %v1811_v23 = vpop.f32.mrb[58].mxu1 }
 0xfc4   :  { %v2813_v24 = vpop.f32.mrb[59].mxu1 }
 0xfc7   :  { %v1879_v27 = vpop.f32.mrb[44].mxu0 }
 0xfc8   :  { %v2818_v28 = vpop.f32.mrb[45].mxu0  ;;  %v1937_v29 = vsel %vm476_vm3, %v1879_v27, -inf }
 0xfc9   :  { %1938 = vmax.xlane.f32.xlu0 %v1937_v29  ;;  %v1882_v30 = vpop.f32.mrb[46].mxu0  ;;  %v1931_v33 = vpop.f32.mrb[60].mxu1 }
 0xfca   :  { %v2819_v34 = vpop.f32.mrb[47].mxu0  ;;  %v2824_v35 = vpop.f32.mrb[61].mxu1  ;;  %v1940_v38 = vsel %vm476_vm3, %v1931_v33, -inf }
 0xfcb   :  { %1941 = vmax.xlane.f32.xlu1 %v1940_v38  ;;  %v1934_v39 = vpop.f32.mrb[62].mxu1 }
 0xfcc   :  { %v2825_v40 = vpop.f32.mrb[63].mxu1 }
 0xfdc   :  { %2011 = vrot.lane.b32.xlu1 %v3268_v32, %s3121_s13 }
 0xfe0   :  { %2082 = vrot.lane.b32.xlu1 %v3227_v57, %s3122_s14 }
 0xfe4   :  { %2134 = vrot.lane.b32.xlu1 %v3232_v63, %s3122_s14 }
 0xfe8   :  { %2131 = vrot.lane.b32.xlu1 %v3245_v3, %s3122_s14 }
0x1056   :  { %v1939_v41 = vpop.xlane.xlu0 %1938 }
0x1057   :  { %v1943_v42 = vsub.f32 %v1879_v27, %v1939_v41 }
0x1058   :  { %v1942_v43 = vpop.xlane.xlu1 %1941 }
0x1059   :  { %v1945_v44 = vmul.f32 1.442695, %v1943_v42  ;;  %v1944_v45 = vsub.f32 %v1931_v33, %v1942_v43 }
0x105b   :  { %2993 = vpow2.f32 %v1945_v44  ;;  %v1947_v46 = vmul.f32 1.442695, %v1944_v45 }
0x105c   :  { %v2012_v47 = vpop.permute.xlu1 %2011 }
0x105d   :  { %2995 = vpow2.f32 %v1947_v46  ;;  %v2017_v48 = vsel %vm504_vm2, %v2012_v47, 0 }
0x105e   :  { %2833 = vmatpush3.bf16.msra.mxu1 %v2017_v48 }
0x105f   :  { %2844 = vmatprep.subr.bf16.mxu1 %v3114_v4 }
0x1060   :  { %v2083_v55 = vpop.permute.xlu1 %2082 }
0x1064   :  { %v2135_v61 = vpop.permute.xlu1 %2134 }
0x1065   :  { %v2994_v57 = vpop.eup %2993  ;;  %v2140_v1 = vsel %vm383_vm1, %v2135_v61, 0 }
0x1066   :  { %v1949_v63 = vsel %vm476_vm3, %v2994_v57, 0.0 }
0x1067   :  { %v2996_v49 = vpop.eup %2995  ;;  %1950 = vadd.xlane.f32.xlu0 %v1949_v63 }
0x1068   :  { %v1952_v3 = vsel %vm476_vm3, %v2996_v49, 0.0  ;;  %v2132_v6 = vpop.permute.xlu1 %2131 }
0x106b   :  { %1953 = vadd.xlane.f32.xlu0 %v1952_v3 }
0x1081   :  { %1962 = vrot.lane.b32.xlu0 %v3243_v2, %s3121_s13 }
0x1085   :  { %2079 = vrot.lane.b32.xlu0 %v3234_v0, %s3122_s14  ;;  %v2088_v0 = vsel %vm383_vm1, %v2083_v55, 0  ;;  %v2938_v55 = vld [vmem:[#allocation11 + $0x28] sm:$0xff]  }
0x10f4   :  { %v1951_v50 = vpop.xlane.xlu0 %1950 }
0x10f5   :  { %2997 = vrcp.f32 %v1951_v50  ;;  %v2933_v50 = vld [vmem:[#allocation11] sm:$0xff]  }
0x10f8   :  { %v1954_v51 = vpop.xlane.xlu0 %1953 }
0x10f9   :  { %2999 = vrcp.f32 %v1954_v51  ;;  %v2934_v51 = vld [vmem:[#allocation11 + $0x8] sm:$0xff]  }
0x10fc   :  { %v1963_v52 = vpop.permute.xlu0 %1962 }
0x10fd   :  { %v1968_v53 = vsel %vm504_vm2, %v1963_v52, 0  ;;  %v2935_v52 = vld [vmem:[#allocation11 + $0x10] sm:$0xff]  }
0x10fe   :  { %2827 = vmatpush3.bf16.msra.mxu0 %v1968_v53  ;;  %v2936_v53 = vld [vmem:[#allocation11 + $0x18] sm:$0xff]  }
0x10ff   :  { %v2998_v54 = vpop.eup %2997  ;;  %2838 = vmatprep.subr.bf16.mxu0 %v3114_v4 }
0x1100   :  { %v1957_v56 = vmul.f32 %v2998_v54, %v2994_v57  ;;  %v2080_v5 = vpop.permute.xlu0 %2079  ;;  %v2937_v54 = vld [vmem:[#allocation11 + $0x20] sm:$0xff]  }
0x1102   :  { %v1959_v58 = vpack.c.bf16 %v1957_v56, %v1957_v56  ;;  %v2939_v56 = vld [vmem:[#allocation11 + $0x30] sm:$0xff]  }
0x1103   :  { %v3000_v59 = vpop.eup %2999 }
0x1104   :  { %v1958_v60 = vmul.f32 %v3000_v59, %v2996_v49  ;;  %2829 = vmatmul.mubr.msk.bf16.vlgmr.msra.gmra.mrb[48].mxu0 %vm476_vm3, %v1959_v58  ;;  %v2940_v58 = vld [vmem:[#allocation11 + $0x38] sm:$0xff]  }
0x1105   :  { %2840 = vmatprep.mubr.msk.bf16.mxu0 %vm3116_vm0, %v3114_v4 }
0x1106   :  { %v1960_v62 = vpack.c.bf16 %v1958_v60, %v1958_v60 }
0x1107   :  { %2839 = vmatpush3.bf16.xpose.msra.mxu0 %v2088_v0 }
0x1108   :  { %2835 = vmatmul.mubr.msk.bf16.vlgmr.msra.gmra.mrb[64].mxu1 %vm476_vm3, %v1960_v62  ;;  %2850 = vmatprep.subr.bf16.mxu0 %v3114_v4 }
0x1109   :  { %2845 = vmatpush3.bf16.xpose.msra.mxu1 %v2140_v1  ;;  %2846 = vmatprep.mubr.msk.bf16.mxu1 %vm3116_vm0, %v3114_v4 }
0x110a   :  { %2856 = vmatprep.subr.bf16.mxu1 %v3114_v4 }
0x110e   :  { %2841 = vmatmul.mubr.msk.bf16.vlgmr.msra.gmra.mrb[52].mxu0 %vm383_vm1, %v2080_v5 }
0x110f   :  { %2852 = vmatprep.mubr.msk.bf16.mxu0 %vm3116_vm0, %v3114_v4 }
0x1110   :  { %2847 = vmatmul.mubr.msk.bf16.vlgmr.msra.gmra.mrb[68].mxu1 %vm383_vm1, %v2132_v6 }
0x1111   :  { %2858 = vmatprep.mubr.msk.bf16.mxu1 %vm3116_vm0, %v3114_v4 }
0x11d7   :  { %v2004_v7 = vpop.f32.mrb[48].mxu0 }
0x11d8   :  { %v2830_v8 = vpop.f32.mrb[49].mxu0 }
0x11d9   :  { %v2007_v11 = vpop.f32.mrb[50].mxu0 }
0x11da   :  { %v2831_v12 = vpop.f32.mrb[51].mxu0 }
0x11db   :  { %v2053_v13 = vpop.f32.mrb[64].mxu1 }
0x11dc   :  { %v2059_v22 = vpack.c.bf16 %v2053_v13, %v2004_v7  ;;  %v2836_v23 = vpop.f32.mrb[65].mxu1 }
0x11dd   :  { %v2056_v24 = vpop.f32.mrb[66].mxu1 }
0x11de   :  { %v2837_v27 = vpop.f32.mrb[67].mxu1  ;;  %v3010_v24 = vld [vmem:[#allocation6 + $0x8] sm:$0xff] }
0x11e1   :  { %v2124_v28 = vpop.f32.mrb[52].mxu0 }
0x11e2   :  { %v2842_v29 = vpop.f32.mrb[53].mxu0  ;;  %v2182_v30 = vsel %vm476_vm3, %v2124_v28, -inf }
0x11e3   :  { %2183 = vmax.xlane.f32.xlu0 %v2182_v30  ;;  %v2127_v33 = vpop.f32.mrb[54].mxu0  ;;  %v2176_v34 = vpop.f32.mrb[68].mxu1 }
0x11e4   :  { %v2843_v35 = vpop.f32.mrb[55].mxu0  ;;  %v2848_v38 = vpop.f32.mrb[69].mxu1  ;;  %v2185_v39 = vsel %vm476_vm3, %v2176_v34, -inf }
0x11e5   :  { %2186 = vmax.xlane.f32.xlu1 %v2185_v39  ;;  %v2179_v40 = vpop.f32.mrb[70].mxu1 }
0x11e6   :  { %v2849_v41 = vpop.f32.mrb[71].mxu1 }
0x11f6   :  { %2256 = vrot.lane.b32.xlu1 %v3268_v32, %s3122_s14 }
0x11fa   :  { %836 = vrot.lane.b32.xlu1 %v834_v37, %s3122_s14 }
0x11fe   :  { %1081 = vrot.lane.b32.xlu1 %v1079_v26, %s3121_s13 }
0x1202   :  { %1571 = vrot.lane.b32.xlu1 %v1569_v16, %s3112_s0 }
0x1206   :  { %2061 = vrot.lane.b32.xlu1 %v2059_v22, %s3118_s4 }
0x1270   :  { %v2184_v42 = vpop.xlane.xlu0 %2183 }
0x1271   :  { %v2188_v43 = vsub.f32 %v2124_v28, %v2184_v42 }
0x1272   :  { %v2187_v32 = vpop.xlane.xlu1 %2186 }
0x1273   :  { %v2190_v44 = vmul.f32 1.442695, %v2188_v43  ;;  %v2189_v45 = vsub.f32 %v2176_v34, %v2187_v32 }
0x1275   :  { %3001 = vpow2.f32 %v2190_v44  ;;  %v2192_v31 = vmul.f32 1.442695, %v2189_v45 }
0x1276   :  { %v2257_v36 = vpop.permute.xlu1 %2256 }
0x1277   :  { %3003 = vpow2.f32 %v2192_v31  ;;  %v2262_v37 = vsel %vm504_vm2, %v2257_v36, 0 }
0x1278   :  { %2857 = vmatpush3.bf16.msra.mxu1 %v2262_v37 }
0x127a   :  { %v837_v21 = vpop.permute.xlu1 %836 }
0x127b   :  { %840 = vst.msk [vmem:[#allocation5] sm:$0xff] %vm839_vm4, %v837_v21 }
0x127e   :  { %v1082_v25 = vpop.permute.xlu1 %1081 }
0x127f   :  { %v3002_v26 = vpop.eup %3001  ;;  %1085 = vst.msk [vmem:[#allocation5] sm:$0xff] %vm1084_vm5, %v1082_v25 }
0x1280   :  { %v2194_v10 = vsel %vm476_vm3, %v3002_v26, 0.0 }
0x1281   :  { %v3004_v15 = vpop.eup %3003  ;;  %2195 = vadd.xlane.f32.xlu0 %v2194_v10 }
0x1282   :  { %v2197_v16 = vsel %vm476_vm3, %v3004_v15, 0.0  ;;  %v1572_v63 = vpop.permute.xlu1 %1571 }
0x1285   :  { %2198 = vadd.xlane.f32.xlu0 %v2197_v16 }
0x1286   :  { %v2062_v49 = vpop.permute.xlu1 %2061 }
0x129b   :  { %2207 = vrot.lane.b32.xlu0 %v3243_v2, %s3122_s14 }
0x129f   :  { %1326 = vrot.lane.b32.xlu0 %v1324_v19, %s3120_s12 }
0x12a3   :  { %1816 = vrot.lane.b32.xlu0 %v1814_v20, %s3119_s11 }
0x130e   :  { %v2196_v46 = vpop.xlane.xlu0 %2195 }
0x130f   :  { %3005 = vrcp.f32 %v2196_v46 }
0x1312   :  { %v2199_v47 = vpop.xlane.xlu0 %2198 }
0x1313   :  { %3007 = vrcp.f32 %v2199_v47 }
0x1316   :  { %v2208_v48 = vpop.permute.xlu0 %2207 }
0x1317   :  { %v2213_v57 = vsel %vm504_vm2, %v2208_v48, 0 }
0x1318   :  { %2851 = vmatpush3.bf16.msra.mxu0 %v2213_v57 }
0x1319   :  { %v3006_v2 = vpop.eup %3005  ;;  %2862 = vmatprep.subr.bf16.mxu0 %v3114_v4 }
0x131a   :  { %v2202_v14 = vmul.f32 %v3006_v2, %v3002_v26  ;;  %v1327_v18 = vpop.permute.xlu0 %1326 }
0x131b   :  { %1330 = vst.msk [vmem:[#allocation5] sm:$0xff] %vm1329_vm6, %v1327_v18 }
0x131c   :  { %v2204_v19 = vpack.c.bf16 %v2202_v14, %v2202_v14  ;;  %1575 = vst.msk [vmem:[#allocation5] sm:$0xff] %vm1574_vm7, %v1572_v63 }
0x131d   :  { %v3008_v9 = vpop.eup %3007 }
0x131e   :  { %v2203_v17 = vmul.f32 %v3008_v9, %v3004_v15  ;;  %2853 = vmatmul.mubr.msk.bf16.vlgmr.msra.gmra.mrb[56].mxu0 %vm476_vm3, %v2204_v19  ;;  %v1817_v20 = vpop.permute.xlu0 %1816 }
0x131f   :  { %1820 = vst.msk [vmem:[#allocation5] sm:$0xff] %vm1819_vm8, %v1817_v20  ;;  %2878 = vmatprep.mubr.msk.bf16.mxu0 %vm3116_vm0, %v3114_v4  ;;  %2863 = vmatpush3.bf16.msra.mxu0 %v2933_v50 }
0x1320   :  { %v2205_v3 = vpack.c.bf16 %v2203_v17, %v2203_v17  ;;  %2065 = vst.msk [vmem:[#allocation5] sm:$0xff] %vm2064_vm9, %v2062_v49  ;;  %2864 = vmatprep.subr.bf16.mxu0 %v3114_v4 }
0x1322   :  { %2859 = vmatmul.mubr.msk.bf16.vlgmr.msra.gmra.mrb[72].mxu1 %vm476_vm3, %v2205_v3 }
0x1323   :  { %2865 = vmatpush3.bf16.msra.mxu0 %v2934_v51 }
0x1324   :  { %2866 = vmatprep.subr.bf16.mxu0 %v3114_v4 }
0x1327   :  { %2867 = vmatpush3.bf16.msra.mxu0 %v2935_v52 }
0x1328   :  { %2868 = vmatprep.subr.bf16.mxu0 %v3114_v4 }
0x132b   :  { %2869 = vmatpush3.bf16.msra.mxu0 %v2936_v53 }
0x132c   :  { %2870 = vmatprep.subr.bf16.mxu0 %v3114_v4 }
0x132f   :  { %2871 = vmatpush3.bf16.msra.mxu0 %v2937_v54 }
0x1330   :  { %2872 = vmatprep.subr.bf16.mxu0 %v3114_v4 }
0x1333   :  { %2873 = vmatpush3.bf16.msra.mxu0 %v2938_v55 }
0x1334   :  { %2874 = vmatprep.subr.bf16.mxu0 %v3114_v4 }
0x1337   :  { %2875 = vmatpush3.bf16.msra.mxu0 %v2939_v56 }
0x1338   :  { %2876 = vmatprep.subr.bf16.mxu0 %v3114_v4  ;;  %v3009_v4 = vld [vmem:[#allocation6] sm:$0xff] }
0x133b   :  { %2877 = vmatpush3.bf16.msra.mxu0 %v2940_v58 }
0x13f1   :  { %v2249_v59 = vpop.f32.mrb[56].mxu0 }
0x13f2   :  { %v2854_v60 = vpop.f32.mrb[57].mxu0 }
0x13f3   :  { %v2252_v61 = vpop.f32.mrb[58].mxu0 }
0x13f4   :  { %v2855_v0 = vpop.f32.mrb[59].mxu0 }
0x13f5   :  { %v2298_v62 = vpop.f32.mrb[72].mxu1 }
0x13f6   :  { %v2304_v1 = vpack.c.bf16 %v2298_v62, %v2249_v59  ;;  %v2860_v5 = vpop.f32.mrb[73].mxu1 }
0x13f7   :  { %v2301_v6 = vpop.f32.mrb[74].mxu1 }
0x13f8   :  { %2306 = vrot.lane.b32.xlu0 %v2304_v1, %s3117_s3  ;;  %v2861_v7 = vpop.f32.mrb[75].mxu1 }
0x146a   :  { %v2307_v8 = vpop.permute.xlu0 %2306 }
0x146b   :  { %2310 = vst.msk [vmem:[#allocation5] sm:$0xff] %vm2309_vm10, %v2307_v8 }
0x1472   :  { %v2313_v11 = vld [vmem:[#allocation5] sm:$0xff] }
0x1473   :  { %2879 = vmatmul.mubr.bf16.vlgmr.msra.gmra.mrb[60].mxu0 %v2313_v11 }
0x1546   :  { %v2412_v12 = vpop.f32.mrb[60].mxu0 }
0x1547   :  { %v2419_v13 = vadd.f32 %v3009_v4, %v2412_v12  ;;  %v2880_v22 = vpop.f32.mrb[61].mxu0 }
0x1548   :  { %v2415_v23 = vpop.f32.mrb[62].mxu0 }
0x1549   :  { %2428 = vst [vmem:[#allocation12] sm:$0xff] %v2419_v13  ;;  %v2420_v27 = vadd.f32 %v3010_v24, %v2415_v23  ;;  %v2881_v28 = vpop.f32.mrb[63].mxu0 }
0x154b   :  { %2429 = vst [vmem:[#allocation12 + $0x8] sm:$0xff] %v2420_v27 }
0x154c   :  { %3088 = shalt.err (!%p3085_p0)
}
0x154d   :  { %s3089_s21 = scalar_lea.hbm %s3598_s5, 256 }
0x154e   :  { %p3090_p1 = scmp.ne.s32.totalorder %s3598_s5, %s3089_s21  ;;  %p3093_p2 = scmp.lt.u32.totalorder %s3089_s21, %s3598_s5 }
0x1550   :  { %p3095_p3 = pnand %p3093_p2, %p3090_p1 }
0x1552   :  { %3098 = shalt.err (!%p3095_p3)
}
0x1553   :  { %2441 = dma.vmem_to_hbm [thread:$0]  %s2436_s16, 256, %s3598_s5, [#allocation8], %s3109_s1, %s3109_s1, %s3110_s17  }
0x1554   :  { %3103 = dma.done.wait [#allocation8], 256  }
0x1555   :  { %3104 = vsyncadd [#allocation8], 4294967040 }
0x1556   :  { %2445 = vsyncpa [#allocation7], 1 }
0x1557   :  { %2446 = vsyncpa [#allocation10], 1 }
0x1558   :  { %2447 = vsyncpa [#allocation8], 1 }

</bundles_post_ra>
